<compile_context>
chip_gen: v7x
topology: tpu7x:2x2x1
jax: 0.10.0
libtpu: 0.0.40
codegen_flags: <defaults>
</compile_context>

<pallas_src>
import collections
import functools

import jax
import jax.numpy as jnp
from jax import lax
from jax.experimental import pallas as pl
from jax.experimental.pallas import tpu as pltpu

LANE = 128
BATCH_ALIGN = 16            # bf16 native sublane tile; also a multiple of 8
COMPUTE_DTYPE = jnp.bfloat16

MLPConfig = collections.namedtuple(
    "MLPConfig", ["input_size", "output_size", "layer_num", "hidden_size"])


def _round_up(x, m):
    return (x + m - 1) // m * m


def _vmem_capacity_bytes():
    """Physical per-core VMEM (128 MiB v5e/v6e, 64 MiB v7x)."""
    try:
        return int(pltpu.get_tpu_info().vmem_capacity_bytes)
    except Exception:
        return 128 * 2**20


def _const_index_map(ndim):
    zeros = (0,) * ndim
    return lambda i: zeros


def _pick_tile_m(batch):
    """Batch tile: >= 2 grid steps once the batch allows it (v7x megacore)."""
    if batch <= BATCH_ALIGN:
        return _round_up(max(batch, 1), BATCH_ALIGN)
    return min(512, _round_up((batch + 1) // 2, BATCH_ALIGN))


# ----------------------------- fused kernel --------------------------------

def _make_fused_mlp_kernel(num_hidden, true_hidden, hid_p, unroll_limit=8):
    """Kernel: x tile -> Linear -> [Linear -> LN -> ReLU]*n -> Linear -> out."""
    inv_n = 1.0 / float(true_hidden)

    def kernel(*refs):
        x_ref = refs[0]
        o_ref = refs[-1]
        if num_hidden > 0:
            (w_in_ref, b_in_ref, wh_ref, bh_ref, g_ref, beta_ref,
             w_out_ref, b_out_ref) = refs[1:-1]
        else:
            w_in_ref, b_in_ref, w_out_ref, b_out_ref = refs[1:-1]

        # Layer 0: Linear(input, hidden). x is already bf16 -> MXU, f32 acc.
        h32 = jnp.dot(x_ref[...], w_in_ref[...],
                      preferred_element_type=jnp.float32) + b_in_ref[...]
        h = h32.astype(COMPUTE_DTYPE)          # bf16 carry between layers

        if num_hidden > 0:
            # Lane mask for the true (unpadded) hidden width; hoisted out of
            # the per-layer loop (broadcasts are not CSE'd by JAX).
            mask = lax.broadcasted_iota(jnp.int32, (1, hid_p), 1) < true_hidden

            def block(l, h_bf16):
                # Linear(hidden, hidden): bf16 operands, f32 accumulation.
                a = jnp.dot(h_bf16, wh_ref[l],
                            preferred_element_type=jnp.float32) + bh_ref[l]
                # Masked two-pass LayerNorm over the true hidden width, then
                # affine + ReLU.  Padded lanes never enter the statistics.
                am = jnp.where(mask, a, 0.0)
                mean = jnp.sum(am, axis=-1, keepdims=True) * inv_n
                centered = jnp.where(mask, a - mean, 0.0)
                var = jnp.sum(centered * centered, axis=-1,
                              keepdims=True) * inv_n
                xhat = centered * lax.rsqrt(var + 1e-5)
                # gamma/beta padding is exactly zero -> padded lanes stay zero,
                # so the next matmul against zero-padded weight rows is exact.
                out = jnp.maximum(xhat * g_ref[l] + beta_ref[l], 0.0)
                return out.astype(COMPUTE_DTYPE)

            if num_hidden <= unroll_limit:
                for l in range(num_hidden):
                    h = block(l, h)
            else:
                # Deep MLPs: keep code size and live ranges flat.
                h = lax.fori_loop(0, num_hidden, block, h)

        out = jnp.dot(h, w_out_ref[...],
                      preferred_element_type=jnp.float32) + b_out_ref[...]
        o_ref[...] = out.astype(o_ref.dtype)

    return kernel


# ----------------------------- parameter setup -----------------------------

def init_mlp_params(key, config, compute_dtype=COMPUTE_DTYPE):
    """Torch-default init (U[-1/sqrt(fan_in), +]), stored padded to lane multiples.

    Weights are stored in `compute_dtype` (bf16) for the MXU; biases and
    LayerNorm params stay f32 (applied after f32 accumulation).  All padding
    is exactly zero.
    """
    input_size, output_size, layer_num, hidden_size = config
    num_hidden = layer_num - 1
    in_p = _round_up(input_size, LANE)
    hid_p = _round_up(hidden_size, LANE)
    out_p = _round_up(output_size, LANE)

    def linear(k, fan_in, fan_out, fan_in_p, fan_out_p):
        kw, kb = jax.random.split(k)
        bound = 1.0 / float(fan_in) ** 0.5
        w = jax.random.uniform(kw, (fan_in, fan_out), jnp.float32, -bound, bound)
        b = jax.random.uniform(kb, (1, fan_out), jnp.float32, -bound, bound)
        w_pad = (jnp.zeros((fan_in_p, fan_out_p), compute_dtype)
                 .at[:fan_in, :fan_out].set(w.astype(compute_dtype)))
        b_pad = jnp.zeros((1, fan_out_p), jnp.float32).at[:, :fan_out].set(b)
        return w_pad, b_pad

    keys = jax.random.split(key, layer_num + 1)
    w_in, b_in = linear(keys[0], input_size, hidden_size, in_p, hid_p)
    w_out, b_out = linear(keys[layer_num], hidden_size, output_size, hid_p, out_p)
    params = {"w_in": w_in, "b_in": b_in, "w_out": w_out, "b_out": b_out}

    if num_hidden > 0:
        w_h, b_h = [], []
        for i in range(num_hidden):
            w, b = linear(keys[1 + i], hidden_size, hidden_size, hid_p, hid_p)
            w_h.append(w)
            b_h.append(b)
        gamma = (jnp.zeros((num_hidden, 1, hid_p), jnp.float32)
                 .at[:, :, :hidden_size].set(1.0))
        beta = jnp.zeros((num_hidden, 1, hid_p), jnp.float32)
        params.update({
            "w_hidden": jnp.stack(w_h),      # (L-1, hid_p, hid_p) bf16
            "b_hidden": jnp.stack(b_h),      # (L-1, 1, hid_p)     f32
            "gamma": gamma,                  # (L-1, 1, hid_p)     f32
            "beta": beta,                    # (L-1, 1, hid_p)     f32
        })
    return params


# ------------------------------- forward pass -------------------------------

@functools.partial(jax.jit, static_argnames=("config", "single_buffer_params"))
def _mlp_forward_impl(params, x, config, single_buffer_params=True):
    input_size, output_size, layer_num, hidden_size = config
    num_hidden = layer_num - 1
    in_p = _round_up(input_size, LANE)
    hid_p = _round_up(hidden_size, LANE)
    out_p = _round_up(output_size, LANE)

    B = x.shape[0]
    TM = _pick_tile_m(B)
    Bp = _round_up(B, TM)

    # x is carried as bf16 (the MXU operand dtype anyway); skip the wrapper-side
    # pad copy entirely when the shape is already aligned.
    if Bp == B and in_p == input_size:
        x_pad = x.astype(COMPUTE_DTYPE)
    else:
        x_pad = (jnp.zeros((Bp, in_p), COMPUTE_DTYPE)
                 .at[:B, :input_size].set(x.astype(COMPUTE_DTYPE)))

    flat = [params["w_in"], params["b_in"]]
    if num_hidden > 0:
        flat += [params["w_hidden"], params["b_hidden"],
                 params["gamma"], params["beta"]]
    flat += [params["w_out"], params["b_out"]]

    kernel = _make_fused_mlp_kernel(num_hidden, hidden_size, hid_p)

    grid = (Bp // TM,)
    x_spec = pl.BlockSpec((TM, in_p), lambda i: (i, 0))
    o_spec = pl.BlockSpec((TM, out_p), lambda i: (i, 0))

    # Weights / biases / LN params: full arrays with a constant block index ->
    # fetched once and VMEM-resident across the whole batch grid.  Single
    # buffered (Buffered(1)) so the resident footprint is 1x, not 2x.
    def const_spec(p):
        idx = _const_index_map(p.ndim)
        if single_buffer_params:
            return pl.BlockSpec(p.shape, idx, pipeline_mode=pl.Buffered(1))
        return pl.BlockSpec(p.shape, idx)

    param_specs = [const_spec(p) for p in flat]

    # Cost estimate + generation-aware VMEM budget.
    param_bytes = sum(int(p.size) * p.dtype.itemsize for p in flat)
    mm_flops = 2 * Bp * (in_p * hid_p + num_hidden * hid_p * hid_p + hid_p * out_p)
    ln_flops = 10 * Bp * hid_p * num_hidden
    bytes_accessed = (Bp * in_p * x_pad.dtype.itemsize
                      + param_bytes + Bp * out_p * 4)
    cost = pl.CostEstimate(flops=mm_flops + ln_flops,
                           transcendentals=Bp * num_hidden,
                           bytes_accessed=bytes_accessed)

    act_bytes = TM * (2 * in_p * 2 + 2 * out_p * 4 + 8 * hid_p * 4)
    need = (param_bytes * (1 if single_buffer_params else 2)
            + act_bytes + (4 << 20))
    cap = _vmem_capacity_bytes()
    vmem_limit = max(32 << 20, min(int(0.85 * cap), int(1.5 * need)))
    vmem_limit = min(vmem_limit, int(0.9 * cap))
    # TODO(synk): if `need` ever exceeds ~0.85*cap (e.g. hidden_size ~4k with
    # many layers on v7x's 64 MiB VMEM), stream the stacked hidden-layer
    # weights per layer with pltpu.emit_pipeline instead of keeping them all
    # resident.

    out_pad = pl.pallas_call(
        kernel,
        # Output kept f32 for downstream consumers; switch to bf16 here to
        # halve the padded output HBM traffic if bf16 is acceptable.
        out_shape=jax.ShapeDtypeStruct((Bp, out_p), jnp.float32),
        grid=grid,
        in_specs=[x_spec] + param_specs,
        out_specs=o_spec,
        compiler_params=pltpu.CompilerParams(
            dimension_semantics=("parallel",),
            vmem_limit_bytes=int(vmem_limit)),
        cost_estimate=cost,
    )(x_pad, *flat)

    return out_pad[:B, :output_size]


def mlp_forward(params, x, config):
    try:
        out = _mlp_forward_impl(params, x, config, single_buffer_params=True)
        return jax.block_until_ready(out)
    except Exception:
        # Fallback if this jax/libtpu rejects Buffered(1) single-buffering.
        out = _mlp_forward_impl(params, x, config, single_buffer_params=False)
        return jax.block_until_ready(out)


# ---------------------------- pure-JAX reference ----------------------------

def mlp_reference(params, x, config):
    input_size, output_size, layer_num, hidden_size = config
    num_hidden = layer_num - 1

    def dense(h, w_pad, b_pad, k, n):
        acc = jnp.dot(h.astype(w_pad.dtype), w_pad[:k, :n],
                      preferred_element_type=jnp.float32)
        return acc + b_pad[:, :n]

    h = dense(x, params["w_in"], params["b_in"], input_size, hidden_size)
    for l in range(num_hidden):
        h = dense(h, params["w_hidden"][l], params["b_hidden"][l],
                  hidden_size, hidden_size)
        mean = jnp.mean(h, axis=-1, keepdims=True)
        var = jnp.mean((h - mean) ** 2, axis=-1, keepdims=True)
        h = ((h - mean) * jax.lax.rsqrt(var + 1e-5)
             * params["gamma"][l][:, :hidden_size]
             + params["beta"][l][:, :hidden_size])
        h = jnp.maximum(h, 0.0)
    return dense(h, params["w_out"], params["b_out"], hidden_size, output_size)


if __name__ == "__main__":
    config = MLPConfig(input_size=16, output_size=10, layer_num=3, hidden_size=32)
    batch = 8

    key = jax.random.PRNGKey(0)
    kp, kx = jax.random.split(key)
    params = init_mlp_params(kp, config)
    x = jax.random.normal(kx, (batch, config.input_size), jnp.float32)

    out = mlp_forward(params, x, config)
    jax.block_until_ready(out)

    ref = mlp_reference(params, x, config)
    assert out.shape == (batch, config.output_size)
    err = float(jnp.max(jnp.abs(out - ref)))
    assert jnp.allclose(out, ref, atol=2e-2, rtol=2e-2), f"max abs err {err}"

    print("KERNEL_OK")
</pallas_src>

<mosaic_0001>
module attributes {stable_mosaic.version = 11 : i64} {
  func.func @kernel(%arg0: i32, %arg1: memref<16x128xbf16, #tpu.memory_space<vmem>>, %arg2: memref<128x128xbf16, #tpu.memory_space<vmem>>, %arg3: memref<1x128xf32, #tpu.memory_space<vmem>>, %arg4: memref<2x128x128xbf16, #tpu.memory_space<vmem>>, %arg5: memref<2x1x128xf32, #tpu.memory_space<vmem>>, %arg6: memref<2x1x128xf32, #tpu.memory_space<vmem>>, %arg7: memref<2x1x128xf32, #tpu.memory_space<vmem>>, %arg8: memref<128x128xbf16, #tpu.memory_space<vmem>>, %arg9: memref<1x128xf32, #tpu.memory_space<vmem>>, %arg10: memref<16x128xf32, #tpu.memory_space<vmem>>) attributes {dimension_semantics = [#tpu.dimension_semantics<parallel>], iteration_bounds = array<i64: 1>, scalar_prefetch = 0 : i64, scratch_operands = 0 : i64, tpu.core_type = #tpu.core_type<tc>, window_params = [{transform_indices = @transform_0, window_bounds = array<i64: 16, 128>}, {pipeline_mode = #tpu.pipeline_mode<synchronous>, transform_indices = @transform_1, window_bounds = array<i64: 128, 128>}, {pipeline_mode = #tpu.pipeline_mode<synchronous>, transform_indices = @transform_2, window_bounds = array<i64: 1, 128>}, {pipeline_mode = #tpu.pipeline_mode<synchronous>, transform_indices = @transform_3, window_bounds = array<i64: 2, 128, 128>}, {pipeline_mode = #tpu.pipeline_mode<synchronous>, transform_indices = @transform_4, window_bounds = array<i64: 2, 1, 128>}, {pipeline_mode = #tpu.pipeline_mode<synchronous>, transform_indices = @transform_5, window_bounds = array<i64: 2, 1, 128>}, {pipeline_mode = #tpu.pipeline_mode<synchronous>, transform_indices = @transform_6, window_bounds = array<i64: 2, 1, 128>}, {pipeline_mode = #tpu.pipeline_mode<synchronous>, transform_indices = @transform_7, window_bounds = array<i64: 128, 128>}, {pipeline_mode = #tpu.pipeline_mode<synchronous>, transform_indices = @transform_8, window_bounds = array<i64: 1, 128>}, {transform_indices = @transform_9, window_bounds = array<i64: 16, 128>}]} {
    %c0 = arith.constant 0 : index
    %c0_0 = arith.constant 0 : index
    %0 = vector.load %arg1[%c0, %c0_0] : memref<16x128xbf16, #tpu.memory_space<vmem>>, vector<16x128xbf16>
    %c0_1 = arith.constant 0 : index
    %c0_2 = arith.constant 0 : index
    %1 = vector.load %arg2[%c0_1, %c0_2] : memref<128x128xbf16, #tpu.memory_space<vmem>>, vector<128x128xbf16>
    %cst = arith.constant dense<0.000000e+00> : vector<16x128xf32>
    %2 = tpu.matmul %0, %1, %cst {dimension_numbers = #tpu.dot_dimension_numbers<[1], [0], [0], [1], [0, 0, 1, 1], [], []>} : vector<16x128xbf16>, vector<128x128xbf16>, vector<16x128xf32> -> vector<16x128xf32>
    %c0_3 = arith.constant 0 : index
    %c0_4 = arith.constant 0 : index
    %3 = vector.load %arg3[%c0_3, %c0_4] : memref<1x128xf32, #tpu.memory_space<vmem>>, vector<1x128xf32>
    %4 = vector.broadcast %3 : vector<1x128xf32> to vector<16x128xf32>
    %5 = arith.addf %2, %4 : vector<16x128xf32>
    %6 = arith.truncf %5 : vector<16x128xf32> to vector<16x128xbf16>
    %7 = tpu.iota {dimensions = array<i32: 1>} : vector<1x128xi32>
    %c32_i32 = arith.constant 32 : i32
    %8 = vector.broadcast %c32_i32 : i32 to vector<1x128xi32>
    %9 = arith.cmpi slt, %7, %8 : vector<1x128xi32>
    %c0_5 = arith.constant 0 : index
    %c0_6 = arith.constant 0 : index
    %c0_7 = arith.constant 0 : index
    %10 = vector.load %arg4[%c0_5, %c0_6, %c0_7] : memref<2x128x128xbf16, #tpu.memory_space<vmem>>, vector<1x128x128xbf16>
    %11 = vector.shape_cast %10 : vector<1x128x128xbf16> to vector<128x128xbf16>
    %cst_8 = arith.constant dense<0.000000e+00> : vector<16x128xf32>
    %12 = tpu.matmul %6, %11, %cst_8 {dimension_numbers = #tpu.dot_dimension_numbers<[1], [0], [0], [1], [0, 0, 1, 1], [], []>} : vector<16x128xbf16>, vector<128x128xbf16>, vector<16x128xf32> -> vector<16x128xf32>
    %c0_9 = arith.constant 0 : index
    %c0_10 = arith.constant 0 : index
    %c0_11 = arith.constant 0 : index
    %13 = vector.load %arg5[%c0_9, %c0_10, %c0_11] : memref<2x1x128xf32, #tpu.memory_space<vmem>>, vector<1x1x128xf32>
    %14 = vector.shape_cast %13 : vector<1x1x128xf32> to vector<1x128xf32>
    %15 = vector.broadcast %14 : vector<1x128xf32> to vector<16x128xf32>
    %16 = arith.addf %12, %15 : vector<16x128xf32>
    %cst_12 = arith.constant 0.000000e+00 : f32
    %17 = vector.shape_cast %9 : vector<1x128xi1> to vector<1x128xi1>
    %18 = vector.broadcast %17 : vector<1x128xi1> to vector<16x128xi1>
    %19 = vector.broadcast %cst_12 : f32 to vector<16x128xf32>
    %20 = arith.select %18, %16, %19 : vector<16x128xi1>, vector<16x128xf32>
    %cst_13 = arith.constant dense<0.000000e+00> : vector<16xf32>
    %21 = vector.multi_reduction <add>, %20, %cst_13 [1] : vector<16x128xf32> to vector<16xf32>
    %22 = vector.shape_cast %21 : vector<16xf32> to vector<16x1xf32>
    %cst_14 = arith.constant 3.125000e-02 : f32
    %23 = vector.broadcast %cst_14 : f32 to vector<16x1xf32>
    %24 = arith.mulf %22, %23 : vector<16x1xf32>
    %25 = vector.broadcast %24 : vector<16x1xf32> to vector<16x128xf32>
    %26 = arith.subf %16, %25 : vector<16x128xf32>
    %cst_15 = arith.constant 0.000000e+00 : f32
    %27 = vector.shape_cast %9 : vector<1x128xi1> to vector<1x128xi1>
    %28 = vector.broadcast %27 : vector<1x128xi1> to vector<16x128xi1>
    %29 = vector.broadcast %cst_15 : f32 to vector<16x128xf32>
    %30 = arith.select %28, %26, %29 : vector<16x128xi1>, vector<16x128xf32>
    %31 = arith.mulf %30, %30 : vector<16x128xf32>
    %cst_16 = arith.constant dense<0.000000e+00> : vector<16xf32>
    %32 = vector.multi_reduction <add>, %31, %cst_16 [1] : vector<16x128xf32> to vector<16xf32>
    %33 = vector.shape_cast %32 : vector<16xf32> to vector<16x1xf32>
    %cst_17 = arith.constant 3.125000e-02 : f32
    %34 = vector.broadcast %cst_17 : f32 to vector<16x1xf32>
    %35 = arith.mulf %33, %34 : vector<16x1xf32>
    %cst_18 = arith.constant 9.99999974E-6 : f32
    %36 = vector.broadcast %cst_18 : f32 to vector<16x1xf32>
    %37 = arith.addf %35, %36 : vector<16x1xf32>
    %38 = math.rsqrt %37 : vector<16x1xf32>
    %39 = vector.broadcast %38 : vector<16x1xf32> to vector<16x128xf32>
    %40 = arith.mulf %30, %39 : vector<16x128xf32>
    %c0_19 = arith.constant 0 : index
    %c0_20 = arith.constant 0 : index
    %c0_21 = arith.constant 0 : index
    %41 = vector.load %arg6[%c0_19, %c0_20, %c0_21] : memref<2x1x128xf32, #tpu.memory_space<vmem>>, vector<1x1x128xf32>
    %42 = vector.shape_cast %41 : vector<1x1x128xf32> to vector<1x128xf32>
    %43 = vector.broadcast %42 : vector<1x128xf32> to vector<16x128xf32>
    %44 = arith.mulf %40, %43 : vector<16x128xf32>
    %c0_22 = arith.constant 0 : index
    %c0_23 = arith.constant 0 : index
    %c0_24 = arith.constant 0 : index
    %45 = vector.load %arg7[%c0_22, %c0_23, %c0_24] : memref<2x1x128xf32, #tpu.memory_space<vmem>>, vector<1x1x128xf32>
    %46 = vector.shape_cast %45 : vector<1x1x128xf32> to vector<1x128xf32>
    %47 = vector.broadcast %46 : vector<1x128xf32> to vector<16x128xf32>
    %48 = arith.addf %44, %47 : vector<16x128xf32>
    %cst_25 = arith.constant 0.000000e+00 : f32
    %49 = vector.broadcast %cst_25 : f32 to vector<16x128xf32>
    %50 = arith.maximumf %48, %49 : vector<16x128xf32>
    %51 = arith.truncf %50 : vector<16x128xf32> to vector<16x128xbf16>
    %c1 = arith.constant 1 : index
    %c0_26 = arith.constant 0 : index
    %c0_27 = arith.constant 0 : index
    %52 = vector.load %arg4[%c1, %c0_26, %c0_27] : memref<2x128x128xbf16, #tpu.memory_space<vmem>>, vector<1x128x128xbf16>
    %53 = vector.shape_cast %52 : vector<1x128x128xbf16> to vector<128x128xbf16>
    %cst_28 = arith.constant dense<0.000000e+00> : vector<16x128xf32>
    %54 = tpu.matmul %51, %53, %cst_28 {dimension_numbers = #tpu.dot_dimension_numbers<[1], [0], [0], [1], [0, 0, 1, 1], [], []>} : vector<16x128xbf16>, vector<128x128xbf16>, vector<16x128xf32> -> vector<16x128xf32>
    %c1_29 = arith.constant 1 : index
    %c0_30 = arith.constant 0 : index
    %c0_31 = arith.constant 0 : index
    %55 = vector.load %arg5[%c1_29, %c0_30, %c0_31] : memref<2x1x128xf32, #tpu.memory_space<vmem>>, vector<1x1x128xf32>
    %56 = vector.shape_cast %55 : vector<1x1x128xf32> to vector<1x128xf32>
    %57 = vector.broadcast %56 : vector<1x128xf32> to vector<16x128xf32>
    %58 = arith.addf %54, %57 : vector<16x128xf32>
    %cst_32 = arith.constant 0.000000e+00 : f32
    %59 = vector.shape_cast %9 : vector<1x128xi1> to vector<1x128xi1>
    %60 = vector.broadcast %59 : vector<1x128xi1> to vector<16x128xi1>
    %61 = vector.broadcast %cst_32 : f32 to vector<16x128xf32>
    %62 = arith.select %60, %58, %61 : vector<16x128xi1>, vector<16x128xf32>
    %cst_33 = arith.constant dense<0.000000e+00> : vector<16xf32>
    %63 = vector.multi_reduction <add>, %62, %cst_33 [1] : vector<16x128xf32> to vector<16xf32>
    %64 = vector.shape_cast %63 : vector<16xf32> to vector<16x1xf32>
    %cst_34 = arith.constant 3.125000e-02 : f32
    %65 = vector.broadcast %cst_34 : f32 to vector<16x1xf32>
    %66 = arith.mulf %64, %65 : vector<16x1xf32>
    %67 = vector.broadcast %66 : vector<16x1xf32> to vector<16x128xf32>
    %68 = arith.subf %58, %67 : vector<16x128xf32>
    %cst_35 = arith.constant 0.000000e+00 : f32
    %69 = vector.shape_cast %9 : vector<1x128xi1> to vector<1x128xi1>
    %70 = vector.broadcast %69 : vector<1x128xi1> to vector<16x128xi1>
    %71 = vector.broadcast %cst_35 : f32 to vector<16x128xf32>
    %72 = arith.select %70, %68, %71 : vector<16x128xi1>, vector<16x128xf32>
    %73 = arith.mulf %72, %72 : vector<16x128xf32>
    %cst_36 = arith.constant dense<0.000000e+00> : vector<16xf32>
    %74 = vector.multi_reduction <add>, %73, %cst_36 [1] : vector<16x128xf32> to vector<16xf32>
    %75 = vector.shape_cast %74 : vector<16xf32> to vector<16x1xf32>
    %cst_37 = arith.constant 3.125000e-02 : f32
    %76 = vector.broadcast %cst_37 : f32 to vector<16x1xf32>
    %77 = arith.mulf %75, %76 : vector<16x1xf32>
    %cst_38 = arith.constant 9.99999974E-6 : f32
    %78 = vector.broadcast %cst_38 : f32 to vector<16x1xf32>
    %79 = arith.addf %77, %78 : vector<16x1xf32>
    %80 = math.rsqrt %79 : vector<16x1xf32>
    %81 = vector.broadcast %80 : vector<16x1xf32> to vector<16x128xf32>
    %82 = arith.mulf %72, %81 : vector<16x128xf32>
    %c1_39 = arith.constant 1 : index
    %c0_40 = arith.constant 0 : index
    %c0_41 = arith.constant 0 : index
    %83 = vector.load %arg6[%c1_39, %c0_40, %c0_41] : memref<2x1x128xf32, #tpu.memory_space<vmem>>, vector<1x1x128xf32>
    %84 = vector.shape_cast %83 : vector<1x1x128xf32> to vector<1x128xf32>
    %85 = vector.broadcast %84 : vector<1x128xf32> to vector<16x128xf32>
    %86 = arith.mulf %82, %85 : vector<16x128xf32>
    %c1_42 = arith.constant 1 : index
    %c0_43 = arith.constant 0 : index
    %c0_44 = arith.constant 0 : index
    %87 = vector.load %arg7[%c1_42, %c0_43, %c0_44] : memref<2x1x128xf32, #tpu.memory_space<vmem>>, vector<1x1x128xf32>
    %88 = vector.shape_cast %87 : vector<1x1x128xf32> to vector<1x128xf32>
    %89 = vector.broadcast %88 : vector<1x128xf32> to vector<16x128xf32>
    %90 = arith.addf %86, %89 : vector<16x128xf32>
    %cst_45 = arith.constant 0.000000e+00 : f32
    %91 = vector.broadcast %cst_45 : f32 to vector<16x128xf32>
    %92 = arith.maximumf %90, %91 : vector<16x128xf32>
    %93 = arith.truncf %92 : vector<16x128xf32> to vector<16x128xbf16>
    %c0_46 = arith.constant 0 : index
    %c0_47 = arith.constant 0 : index
    %94 = vector.load %arg8[%c0_46, %c0_47] : memref<128x128xbf16, #tpu.memory_space<vmem>>, vector<128x128xbf16>
    %cst_48 = arith.constant dense<0.000000e+00> : vector<16x128xf32>
    %95 = tpu.matmul %93, %94, %cst_48 {dimension_numbers = #tpu.dot_dimension_numbers<[1], [0], [0], [1], [0, 0, 1, 1], [], []>} : vector<16x128xbf16>, vector<128x128xbf16>, vector<16x128xf32> -> vector<16x128xf32>
    %c0_49 = arith.constant 0 : index
    %c0_50 = arith.constant 0 : index
    %96 = vector.load %arg9[%c0_49, %c0_50] : memref<1x128xf32, #tpu.memory_space<vmem>>, vector<1x128xf32>
    %97 = vector.broadcast %96 : vector<1x128xf32> to vector<16x128xf32>
    %98 = arith.addf %95, %97 : vector<16x128xf32>
    %c0_51 = arith.constant 0 : index
    %c0_52 = arith.constant 0 : index
    %99 = vector.load %arg10[%c0_51, %c0_52] : memref<16x128xf32, #tpu.memory_space<vmem>>, vector<16x128xf32>
    tpu.vector_store %arg10[%c0_51, %c0_52], %98 {strides = array<i32>} : memref<16x128xf32, #tpu.memory_space<vmem>>, vector<16x128xf32>,
    return
  }
  func.func @transform_0(%arg0: i32) -> (i32, i32) {
    %c0_i32 = arith.constant 0 : i32
    %c0_i32_0 = arith.constant 0 : i32
    return %arg0, %c0_i32 : i32, i32
  }
  func.func @transform_1(%arg0: i32) -> (i32, i32) {
    %c0_i32 = arith.constant 0 : i32
    %c0_i32_0 = arith.constant 0 : i32
    %c0_i32_1 = arith.constant 0 : i32
    return %c0_i32, %c0_i32_0 : i32, i32
  }
  func.func @transform_2(%arg0: i32) -> (i32, i32) {
    %c0_i32 = arith.constant 0 : i32
    %c0_i32_0 = arith.constant 0 : i32
    %c0_i32_1 = arith.constant 0 : i32
    return %c0_i32, %c0_i32_0 : i32, i32
  }
  func.func @transform_3(%arg0: i32) -> (i32, i32, i32) {
    %c0_i32 = arith.constant 0 : i32
    %c0_i32_0 = arith.constant 0 : i32
    %c0_i32_1 = arith.constant 0 : i32
    %c0_i32_2 = arith.constant 0 : i32
    return %c0_i32, %c0_i32_0, %c0_i32_1 : i32, i32, i32
  }
  func.func @transform_4(%arg0: i32) -> (i32, i32, i32) {
    %c0_i32 = arith.constant 0 : i32
    %c0_i32_0 = arith.constant 0 : i32
    %c0_i32_1 = arith.constant 0 : i32
    %c0_i32_2 = arith.constant 0 : i32
    return %c0_i32, %c0_i32_0, %c0_i32_1 : i32, i32, i32
  }
  func.func @transform_5(%arg0: i32) -> (i32, i32, i32) {
    %c0_i32 = arith.constant 0 : i32
    %c0_i32_0 = arith.constant 0 : i32
    %c0_i32_1 = arith.constant 0 : i32
    %c0_i32_2 = arith.constant 0 : i32
    return %c0_i32, %c0_i32_0, %c0_i32_1 : i32, i32, i32
  }
  func.func @transform_6(%arg0: i32) -> (i32, i32, i32) {
    %c0_i32 = arith.constant 0 : i32
    %c0_i32_0 = arith.constant 0 : i32
    %c0_i32_1 = arith.constant 0 : i32
    %c0_i32_2 = arith.constant 0 : i32
    return %c0_i32, %c0_i32_0, %c0_i32_1 : i32, i32, i32
  }
  func.func @transform_7(%arg0: i32) -> (i32, i32) {
    %c0_i32 = arith.constant 0 : i32
    %c0_i32_0 = arith.constant 0 : i32
    %c0_i32_1 = arith.constant 0 : i32
    return %c0_i32, %c0_i32_0 : i32, i32
  }
  func.func @transform_8(%arg0: i32) -> (i32, i32) {
    %c0_i32 = arith.constant 0 : i32
    %c0_i32_0 = arith.constant 0 : i32
    %c0_i32_1 = arith.constant 0 : i32
    return %c0_i32, %c0_i32_0 : i32, i32
  }
  func.func @transform_9(%arg0: i32) -> (i32, i32) {
    %c0_i32 = arith.constant 0 : i32
    %c0_i32_0 = arith.constant 0 : i32
    return %arg0, %c0_i32 : i32, i32
  }
}

module attributes {stable_mosaic.version = 11 : i64} {
  func.func @kernel(%arg0: i32, %arg1: memref<16x128xbf16, #tpu.memory_space<vmem>>, %arg2: memref<128x128xbf16, #tpu.memory_space<vmem>>, %arg3: memref<1x128xf32, #tpu.memory_space<vmem>>, %arg4: memref<2x128x128xbf16, #tpu.memory_space<vmem>>, %arg5: memref<2x1x128xf32, #tpu.memory_space<vmem>>, %arg6: memref<2x1x128xf32, #tpu.memory_space<vmem>>, %arg7: memref<2x1x128xf32, #tpu.memory_space<vmem>>, %arg8: memref<128x128xbf16, #tpu.memory_space<vmem>>, %arg9: memref<1x128xf32, #tpu.memory_space<vmem>>, %arg10: memref<16x128xf32, #tpu.memory_space<vmem>>) attributes {dimension_semantics = [#tpu.dimension_semantics<parallel>], iteration_bounds = array<i64: 1>, scalar_prefetch = 0 : i64, scratch_operands = 0 : i64, tpu.core_type = #tpu.core_type<tc>, window_params = [{transform_indices = @transform_0, window_bounds = array<i64: 16, 128>}, {pipeline_mode = #tpu.pipeline_mode<synchronous>, transform_indices = @transform_1, window_bounds = array<i64: 128, 128>}, {pipeline_mode = #tpu.pipeline_mode<synchronous>, transform_indices = @transform_2, window_bounds = array<i64: 1, 128>}, {pipeline_mode = #tpu.pipeline_mode<synchronous>, transform_indices = @transform_3, window_bounds = array<i64: 2, 128, 128>}, {pipeline_mode = #tpu.pipeline_mode<synchronous>, transform_indices = @transform_4, window_bounds = array<i64: 2, 1, 128>}, {pipeline_mode = #tpu.pipeline_mode<synchronous>, transform_indices = @transform_5, window_bounds = array<i64: 2, 1, 128>}, {pipeline_mode = #tpu.pipeline_mode<synchronous>, transform_indices = @transform_6, window_bounds = array<i64: 2, 1, 128>}, {pipeline_mode = #tpu.pipeline_mode<synchronous>, transform_indices = @transform_7, window_bounds = array<i64: 128, 128>}, {pipeline_mode = #tpu.pipeline_mode<synchronous>, transform_indices = @transform_8, window_bounds = array<i64: 1, 128>}, {transform_indices = @transform_9, window_bounds = array<i64: 16, 128>}]} {
    %c0 = arith.constant 0 : index
    %c0_0 = arith.constant 0 : index
    %0 = vector.load %arg1[%c0, %c0_0] : memref<16x128xbf16, #tpu.memory_space<vmem>>, vector<16x128xbf16>
    %c0_1 = arith.constant 0 : index
    %c0_2 = arith.constant 0 : index
    %1 = vector.load %arg2[%c0_1, %c0_2] : memref<128x128xbf16, #tpu.memory_space<vmem>>, vector<128x128xbf16>
    %cst = arith.constant dense<0.000000e+00> : vector<16x128xf32>
    %2 = tpu.matmul %0, %1, %cst {dimension_numbers = #tpu.dot_dimension_numbers<[1], [0], [0], [1], [0, 0, 1, 1], [], []>} : vector<16x128xbf16>, vector<128x128xbf16>, vector<16x128xf32> -> vector<16x128xf32>
    %c0_3 = arith.constant 0 : index
    %c0_4 = arith.constant 0 : index
    %3 = vector.load %arg3[%c0_3, %c0_4] : memref<1x128xf32, #tpu.memory_space<vmem>>, vector<1x128xf32>
    %4 = vector.broadcast %3 : vector<1x128xf32> to vector<16x128xf32>
    %5 = arith.addf %2, %4 : vector<16x128xf32>
    %6 = arith.truncf %5 : vector<16x128xf32> to vector<16x128xbf16>
    %7 = tpu.iota {dimensions = array<i32: 1>} : vector<1x128xi32>
    %c32_i32 = arith.constant 32 : i32
    %8 = vector.broadcast %c32_i32 : i32 to vector<1x128xi32>
    %9 = arith.cmpi slt, %7, %8 : vector<1x128xi32>
    %c0_5 = arith.constant 0 : index
    %c0_6 = arith.constant 0 : index
    %c0_7 = arith.constant 0 : index
    %10 = vector.load %arg4[%c0_5, %c0_6, %c0_7] : memref<2x128x128xbf16, #tpu.memory_space<vmem>>, vector<1x128x128xbf16>
    %11 = vector.shape_cast %10 : vector<1x128x128xbf16> to vector<128x128xbf16>
    %cst_8 = arith.constant dense<0.000000e+00> : vector<16x128xf32>
    %12 = tpu.matmul %6, %11, %cst_8 {dimension_numbers = #tpu.dot_dimension_numbers<[1], [0], [0], [1], [0, 0, 1, 1], [], []>} : vector<16x128xbf16>, vector<128x128xbf16>, vector<16x128xf32> -> vector<16x128xf32>
    %c0_9 = arith.constant 0 : index
    %c0_10 = arith.constant 0 : index
    %c0_11 = arith.constant 0 : index
    %13 = vector.load %arg5[%c0_9, %c0_10, %c0_11] : memref<2x1x128xf32, #tpu.memory_space<vmem>>, vector<1x1x128xf32>
    %14 = vector.shape_cast %13 : vector<1x1x128xf32> to vector<1x128xf32>
    %15 = vector.broadcast %14 : vector<1x128xf32> to vector<16x128xf32>
    %16 = arith.addf %12, %15 : vector<16x128xf32>
    %cst_12 = arith.constant 0.000000e+00 : f32
    %17 = vector.shape_cast %9 : vector<1x128xi1> to vector<1x128xi1>
    %18 = vector.broadcast %17 : vector<1x128xi1> to vector<16x128xi1>
    %19 = vector.broadcast %cst_12 : f32 to vector<16x128xf32>
    %20 = arith.select %18, %16, %19 : vector<16x128xi1>, vector<16x128xf32>
    %cst_13 = arith.constant dense<0.000000e+00> : vector<16xf32>
    %21 = vector.multi_reduction <add>, %20, %cst_13 [1] : vector<16x128xf32> to vector<16xf32>
    %22 = vector.shape_cast %21 : vector<16xf32> to vector<16x1xf32>
    %cst_14 = arith.constant 3.125000e-02 : f32
    %23 = vector.broadcast %cst_14 : f32 to vector<16x1xf32>
    %24 = arith.mulf %22, %23 : vector<16x1xf32>
    %25 = vector.broadcast %24 : vector<16x1xf32> to vector<16x128xf32>
    %26 = arith.subf %16, %25 : vector<16x128xf32>
    %cst_15 = arith.constant 0.000000e+00 : f32
    %27 = vector.shape_cast %9 : vector<1x128xi1> to vector<1x128xi1>
    %28 = vector.broadcast %27 : vector<1x128xi1> to vector<16x128xi1>
    %29 = vector.broadcast %cst_15 : f32 to vector<16x128xf32>
    %30 = arith.select %28, %26, %29 : vector<16x128xi1>, vector<16x128xf32>
    %31 = arith.mulf %30, %30 : vector<16x128xf32>
    %cst_16 = arith.constant dense<0.000000e+00> : vector<16xf32>
    %32 = vector.multi_reduction <add>, %31, %cst_16 [1] : vector<16x128xf32> to vector<16xf32>
    %33 = vector.shape_cast %32 : vector<16xf32> to vector<16x1xf32>
    %cst_17 = arith.constant 3.125000e-02 : f32
    %34 = vector.broadcast %cst_17 : f32 to vector<16x1xf32>
    %35 = arith.mulf %33, %34 : vector<16x1xf32>
    %cst_18 = arith.constant 9.99999974E-6 : f32
    %36 = vector.broadcast %cst_18 : f32 to vector<16x1xf32>
    %37 = arith.addf %35, %36 : vector<16x1xf32>
    %38 = math.rsqrt %37 : vector<16x1xf32>
    %39 = vector.broadcast %38 : vector<16x1xf32> to vector<16x128xf32>
    %40 = arith.mulf %30, %39 : vector<16x128xf32>
    %c0_19 = arith.constant 0 : index
    %c0_20 = arith.constant 0 : index
    %c0_21 = arith.constant 0 : index
    %41 = vector.load %arg6[%c0_19, %c0_20, %c0_21] : memref<2x1x128xf32, #tpu.memory_space<vmem>>, vector<1x1x128xf32>
    %42 = vector.shape_cast %41 : vector<1x1x128xf32> to vector<1x128xf32>
    %43 = vector.broadcast %42 : vector<1x128xf32> to vector<16x128xf32>
    %44 = arith.mulf %40, %43 : vector<16x128xf32>
    %c0_22 = arith.constant 0 : index
    %c0_23 = arith.constant 0 : index
    %c0_24 = arith.constant 0 : index
    %45 = vector.load %arg7[%c0_22, %c0_23, %c0_24] : memref<2x1x128xf32, #tpu.memory_space<vmem>>, vector<1x1x128xf32>
    %46 = vector.shape_cast %45 : vector<1x1x128xf32> to vector<1x128xf32>
    %47 = vector.broadcast %46 : vector<1x128xf32> to vector<16x128xf32>
    %48 = arith.addf %44, %47 : vector<16x128xf32>
    %cst_25 = arith.constant 0.000000e+00 : f32
    %49 = vector.broadcast %cst_25 : f32 to vector<16x128xf32>
    %50 = arith.maximumf %48, %49 : vector<16x128xf32>
    %51 = arith.truncf %50 : vector<16x128xf32> to vector<16x128xbf16>
    %c1 = arith.constant 1 : index
    %c0_26 = arith.constant 0 : index
    %c0_27 = arith.constant 0 : index
    %52 = vector.load %arg4[%c1, %c0_26, %c0_27] : memref<2x128x128xbf16, #tpu.memory_space<vmem>>, vector<1x128x128xbf16>
    %53 = vector.shape_cast %52 : vector<1x128x128xbf16> to vector<128x128xbf16>
    %cst_28 = arith.constant dense<0.000000e+00> : vector<16x128xf32>
    %54 = tpu.matmul %51, %53, %cst_28 {dimension_numbers = #tpu.dot_dimension_numbers<[1], [0], [0], [1], [0, 0, 1, 1], [], []>} : vector<16x128xbf16>, vector<128x128xbf16>, vector<16x128xf32> -> vector<16x128xf32>
    %c1_29 = arith.constant 1 : index
    %c0_30 = arith.constant 0 : index
    %c0_31 = arith.constant 0 : index
    %55 = vector.load %arg5[%c1_29, %c0_30, %c0_31] : memref<2x1x128xf32, #tpu.memory_space<vmem>>, vector<1x1x128xf32>
    %56 = vector.shape_cast %55 : vector<1x1x128xf32> to vector<1x128xf32>
    %57 = vector.broadcast %56 : vector<1x128xf32> to vector<16x128xf32>
    %58 = arith.addf %54, %57 : vector<16x128xf32>
    %cst_32 = arith.constant 0.000000e+00 : f32
    %59 = vector.shape_cast %9 : vector<1x128xi1> to vector<1x128xi1>
    %60 = vector.broadcast %59 : vector<1x128xi1> to vector<16x128xi1>
    %61 = vector.broadcast %cst_32 : f32 to vector<16x128xf32>
    %62 = arith.select %60, %58, %61 : vector<16x128xi1>, vector<16x128xf32>
    %cst_33 = arith.constant dense<0.000000e+00> : vector<16xf32>
    %63 = vector.multi_reduction <add>, %62, %cst_33 [1] : vector<16x128xf32> to vector<16xf32>
    %64 = vector.shape_cast %63 : vector<16xf32> to vector<16x1xf32>
    %cst_34 = arith.constant 3.125000e-02 : f32
    %65 = vector.broadcast %cst_34 : f32 to vector<16x1xf32>
    %66 = arith.mulf %64, %65 : vector<16x1xf32>
    %67 = vector.broadcast %66 : vector<16x1xf32> to vector<16x128xf32>
    %68 = arith.subf %58, %67 : vector<16x128xf32>
    %cst_35 = arith.constant 0.000000e+00 : f32
    %69 = vector.shape_cast %9 : vector<1x128xi1> to vector<1x128xi1>
    %70 = vector.broadcast %69 : vector<1x128xi1> to vector<16x128xi1>
    %71 = vector.broadcast %cst_35 : f32 to vector<16x128xf32>
    %72 = arith.select %70, %68, %71 : vector<16x128xi1>, vector<16x128xf32>
    %73 = arith.mulf %72, %72 : vector<16x128xf32>
    %cst_36 = arith.constant dense<0.000000e+00> : vector<16xf32>
    %74 = vector.multi_reduction <add>, %73, %cst_36 [1] : vector<16x128xf32> to vector<16xf32>
    %75 = vector.shape_cast %74 : vector<16xf32> to vector<16x1xf32>
    %cst_37 = arith.constant 3.125000e-02 : f32
    %76 = vector.broadcast %cst_37 : f32 to vector<16x1xf32>
    %77 = arith.mulf %75, %76 : vector<16x1xf32>
    %cst_38 = arith.constant 9.99999974E-6 : f32
    %78 = vector.broadcast %cst_38 : f32 to vector<16x1xf32>
    %79 = arith.addf %77, %78 : vector<16x1xf32>
    %80 = math.rsqrt %79 : vector<16x1xf32>
    %81 = vector.broadcast %80 : vector<16x1xf32> to vector<16x128xf32>
    %82 = arith.mulf %72, %81 : vector<16x128xf32>
    %c1_39 = arith.constant 1 : index
    %c0_40 = arith.constant 0 : index
    %c0_41 = arith.constant 0 : index
    %83 = vector.load %arg6[%c1_39, %c0_40, %c0_41] : memref<2x1x128xf32, #tpu.memory_space<vmem>>, vector<1x1x128xf32>
    %84 = vector.shape_cast %83 : vector<1x1x128xf32> to vector<1x128xf32>
    %85 = vector.broadcast %84 : vector<1x128xf32> to vector<16x128xf32>
    %86 = arith.mulf %82, %85 : vector<16x128xf32>
    %c1_42 = arith.constant 1 : index
    %c0_43 = arith.constant 0 : index
    %c0_44 = arith.constant 0 : index
    %87 = vector.load %arg7[%c1_42, %c0_43, %c0_44] : memref<2x1x128xf32, #tpu.memory_space<vmem>>, vector<1x1x128xf32>
    %88 = vector.shape_cast %87 : vector<1x1x128xf32> to vector<1x128xf32>
    %89 = vector.broadcast %88 : vector<1x128xf32> to vector<16x128xf32>
    %90 = arith.addf %86, %89 : vector<16x128xf32>
    %cst_45 = arith.constant 0.000000e+00 : f32
    %91 = vector.broadcast %cst_45 : f32 to vector<16x128xf32>
    %92 = arith.maximumf %90, %91 : vector<16x128xf32>
    %93 = arith.truncf %92 : vector<16x128xf32> to vector<16x128xbf16>
    %c0_46 = arith.constant 0 : index
    %c0_47 = arith.constant 0 : index
    %94 = vector.load %arg8[%c0_46, %c0_47] : memref<128x128xbf16, #tpu.memory_space<vmem>>, vector<128x128xbf16>
    %cst_48 = arith.constant dense<0.000000e+00> : vector<16x128xf32>
    %95 = tpu.matmul %93, %94, %cst_48 {dimension_numbers = #tpu.dot_dimension_numbers<[1], [0], [0], [1], [0, 0, 1, 1], [], []>} : vector<16x128xbf16>, vector<128x128xbf16>, vector<16x128xf32> -> vector<16x128xf32>
    %c0_49 = arith.constant 0 : index
    %c0_50 = arith.constant 0 : index
    %96 = vector.load %arg9[%c0_49, %c0_50] : memref<1x128xf32, #tpu.memory_space<vmem>>, vector<1x128xf32>
    %97 = vector.broadcast %96 : vector<1x128xf32> to vector<16x128xf32>
    %98 = arith.addf %95, %97 : vector<16x128xf32>
    %c0_51 = arith.constant 0 : index
    %c0_52 = arith.constant 0 : index
    %99 = vector.load %arg10[%c0_51, %c0_52] : memref<16x128xf32, #tpu.memory_space<vmem>>, vector<16x128xf32>
    tpu.vector_store %arg10[%c0_51, %c0_52], %98 {strides = array<i32>} : memref<16x128xf32, #tpu.memory_space<vmem>>, vector<16x128xf32>,
    return
  }
  func.func @transform_0(%arg0: i32) -> (i32, i32) {
    %c0_i32 = arith.constant 0 : i32
    %c0_i32_0 = arith.constant 0 : i32
    return %arg0, %c0_i32 : i32, i32
  }
  func.func @transform_1(%arg0: i32) -> (i32, i32) {
    %c0_i32 = arith.constant 0 : i32
    %c0_i32_0 = arith.constant 0 : i32
    %c0_i32_1 = arith.constant 0 : i32
    return %c0_i32, %c0_i32_0 : i32, i32
  }
  func.func @transform_2(%arg0: i32) -> (i32, i32) {
    %c0_i32 = arith.constant 0 : i32
    %c0_i32_0 = arith.constant 0 : i32
    %c0_i32_1 = arith.constant 0 : i32
    return %c0_i32, %c0_i32_0 : i32, i32
  }
  func.func @transform_3(%arg0: i32) -> (i32, i32, i32) {
    %c0_i32 = arith.constant 0 : i32
    %c0_i32_0 = arith.constant 0 : i32
    %c0_i32_1 = arith.constant 0 : i32
    %c0_i32_2 = arith.constant 0 : i32
    return %c0_i32, %c0_i32_0, %c0_i32_1 : i32, i32, i32
  }
  func.func @transform_4(%arg0: i32) -> (i32, i32, i32) {
    %c0_i32 = arith.constant 0 : i32
    %c0_i32_0 = arith.constant 0 : i32
    %c0_i32_1 = arith.constant 0 : i32
    %c0_i32_2 = arith.constant 0 : i32
    return %c0_i32, %c0_i32_0, %c0_i32_1 : i32, i32, i32
  }
  func.func @transform_5(%arg0: i32) -> (i32, i32, i32) {
    %c0_i32 = arith.constant 0 : i32
    %c0_i32_0 = arith.constant 0 : i32
    %c0_i32_1 = arith.constant 0 : i32
    %c0_i32_2 = arith.constant 0 : i32
    return %c0_i32, %c0_i32_0, %c0_i32_1 : i32, i32, i32
  }
  func.func @transform_6(%arg0: i32) -> (i32, i32, i32) {
    %c0_i32 = arith.constant 0 : i32
    %c0_i32_0 = arith.constant 0 : i32
    %c0_i32_1 = arith.constant 0 : i32
    %c0_i32_2 = arith.constant 0 : i32
    return %c0_i32, %c0_i32_0, %c0_i32_1 : i32, i32, i32
  }
  func.func @transform_7(%arg0: i32) -> (i32, i32) {
    %c0_i32 = arith.constant 0 : i32
    %c0_i32_0 = arith.constant 0 : i32
    %c0_i32_1 = arith.constant 0 : i32
    return %c0_i32, %c0_i32_0 : i32, i32
  }
  func.func @transform_8(%arg0: i32) -> (i32, i32) {
    %c0_i32 = arith.constant 0 : i32
    %c0_i32_0 = arith.constant 0 : i32
    %c0_i32_1 = arith.constant 0 : i32
    return %c0_i32, %c0_i32_0 : i32, i32
  }
  func.func @transform_9(%arg0: i32) -> (i32, i32) {
    %c0_i32 = arith.constant 0 : i32
    %c0_i32_0 = arith.constant 0 : i32
    return %arg0, %c0_i32 : i32, i32
  }
}

</mosaic_0001>

<bundles_post_ra>
// kernel: _mlp_forward_impl.1
= control target key start
LH: loop header
LB: loop body
LE: loop exit
PB: predicated region body
PF: predicated region fallthrough
CT: control target
= control target key end

     0   :  { %14 = vsyncpa [#allocation3], 0  ;;  %s1121_s0 = inlined_call_operand.vmem [shape: bf16[16,128], index: 0, kind: input, shape index: {}]   ;;  %s1122_s1 = inlined_call_operand.hbm [shape: bf16[128,128], index: 1, kind: input, shape index: {}]   ;;  %s1123_s2 = inlined_call_operand.vmem [shape: f32[1,128], index: 2, kind: input, shape index: {}]   ;;  %s1124_s3 = inlined_call_operand.hbm [shape: bf16[2,128,128], index: 3, kind: input, shape index: {}]   ;;  %s1125_s4 = inlined_call_operand.vmem [shape: f32[2,1,128], index: 4, kind: input, shape index: {}]   ;;  %s1126_s5 = inlined_call_operand.vmem [shape: f32[2,1,128], index: 5, kind: input, shape index: {}]   ;;  %s1127_s6 = inlined_call_operand.vmem [shape: f32[2,1,128], index: 6, kind: input, shape index: {}]   ;;  %s1128_s7 = inlined_call_operand.hbm [shape: bf16[128,128], index: 7, kind: input, shape index: {}]   ;;  %s1129_s8 = inlined_call_operand.vmem [shape: f32[1,128], index: 8, kind: input, shape index: {}]   ;;  %s1130_s9 = inlined_call_operand.vmem [shape: f32[16,128], index: 9, kind: output, shape index: {}]  }
   0x1   :  { %15 = vsyncpa [#allocation5], 0  ;;  %s920_s30 = smov [#allocation4]   ;;  %s921_s11 = smov [#allocation2]  }
   0x2   :  { %s37_s10 = sshll.u32 %s920_s30, 4  ;;  %s23_s12 = sshll.u32 %s921_s11, 4  ;;  %s38_s10 = int_to_ptr.vmem [resolvable:$true] %s37_s10  ;;  %s977_s12 = int_to_ptr.vmem [resolvable:$true] %s23_s12 }
   0x3   :  { %s850_s15 = scalar_lea.hbm %s1124_s3, 2048 }
   0x4   :  { %p851_p0 = scmp.ne.s32.totalorder %s1124_s3, %s850_s15  ;;  %p854_p1 = scmp.lt.u32.totalorder %s850_s15, %s1124_s3 }
   0x6   :  { %p856_p2 = pnand %p854_p1, %p851_p0 }
   0x8   :  { %859 = shalt.err (!%p856_p2)
}
   0x9   :  { %s860_s20 = scalar_lea.vmem %s38_s10, 2048  ;;  %p865_p4 = scmp.lt.s32.totalorder %s38_s10, %s38_s10 }
   0xa   :  { %p861_p3 = scmp.ne.s32.totalorder %s38_s10, %s860_s20  ;;  %p866_p5 = scmp.lt.s32.totalorder %s860_s20, %s860_s20 }
   0xc   :  { %p867_p6 = por %p866_p5, %p865_p4 }
   0xe   :  { %p868_p7 = pnand %p867_p6, %p861_p3 }
  0x10   :  { %871 = shalt.err (!%p868_p7)
}
  0x11   :  { %s922_s21 = smov 64   ;;  %s923_s22 = smov 4  }
  0x12   :  { %43 = dma.hbm_to_vmem [thread:$0]  %s1124_s3, 2048, %s38_s10, [#allocation5], %s922_s21, %s922_s21, %s923_s22  }
  0x13   :  { %s872_s27 = scalar_lea.hbm %s1122_s1, 1024 }
  0x14   :  { %p873_p8 = scmp.ne.s32.totalorder %s1122_s1, %s872_s27  ;;  %p876_p9 = scmp.lt.u32.totalorder %s872_s27, %s1122_s1 }
  0x16   :  { %p878_p10 = pnand %p876_p9, %p873_p8 }
  0x18   :  { %881 = shalt.err (!%p878_p10)
}
  0x19   :  { %s882_s13 = scalar_lea.vmem %s977_s12, 1024  ;;  %p887_p12 = scmp.lt.s32.totalorder %s977_s12, %s977_s12 }
  0x1a   :  { %p883_p11 = scmp.ne.s32.totalorder %s977_s12, %s882_s13  ;;  %p888_p13 = scmp.lt.s32.totalorder %s882_s13, %s882_s13 }
  0x1c   :  { %p889_p0 = por %p888_p13, %p887_p12 }
  0x1e   :  { %p890_p1 = pnand %p889_p0, %p883_p11 }
  0x20   :  { %893 = shalt.err (!%p890_p1)
}
  0x21   :  { %29 = dma.hbm_to_vmem [thread:$0]  %s1122_s1, 1024, %s977_s12, [#allocation3], %s922_s21, %s922_s21, %s923_s22  }
  0x22   :  { %s924_s14 = smov [#allocation6]   ;;  %s894_s18 = scalar_lea.hbm %s1128_s7, 1024 }
  0x23   :  { %s55_s15 = sshll.u32 %s924_s14, 4  ;;  %p895_p2 = scmp.ne.s32.totalorder %s1128_s7, %s894_s18  ;;  %s56_s15 = int_to_ptr.vmem [resolvable:$true] %s55_s15 }
  0x24   :  { %p898_p3 = scmp.lt.u32.totalorder %s894_s18, %s1128_s7 }
  0x26   :  { %p900_p4 = pnand %p898_p3, %p895_p2 }
  0x28   :  { %903 = shalt.err (!%p900_p4)
}
  0x29   :  { %s904_s25 = scalar_lea.vmem %s56_s15, 1024  ;;  %p909_p6 = scmp.lt.s32.totalorder %s56_s15, %s56_s15 }
  0x2a   :  { %p905_p5 = scmp.ne.s32.totalorder %s56_s15, %s904_s25  ;;  %p910_p7 = scmp.lt.s32.totalorder %s904_s25, %s904_s25 }
  0x2c   :  { %p911_p8 = por %p910_p7, %p909_p6 }
  0x2e   :  { %p912_p9 = pnand %p911_p8, %p905_p5 }
  0x30   :  { %915 = shalt.err (!%p912_p9)
}
  0x31   :  { %61 = dma.hbm_to_vmem [thread:$0]  %s1128_s7, 1024, %s56_s15, [#allocation5], %s922_s21, %s922_s21, %s923_s22  }
  0x32   :  { %916 = dma.done.wait [#allocation3], 1024  }
  0x33   :  { %917 = vsyncadd [#allocation3], 4294966272 }
  0x34   :  { %918 = dma.done.wait [#allocation5], 3072  }
  0x35   :  { %919 = vsyncadd [#allocation5], 4294964224  ;;  %v925_v0 = vmov 0.0   ;;  %vm926_vm0 = vmmov 0   ;;  %v809_v1 = vld [vmem:[#allocation2] sm:$0xff]   ;;  %v810_v2 = vld [vmem:[#allocation2 + $0x8] sm:$0xff]   ;;  %v195_v26 = vlaneseq }
  0x36   :  { %722 = vmatprep.subr.bf16.mxu0 %v925_v0  ;;  %738 = vmatprep.mubr.msk.bf16.mxu0 %vm926_vm0, %v925_v0  ;;  %v811_v3 = vld [vmem:[#allocation2 + $0x10] sm:$0xff]   ;;  %v818_v4 = vld [vmem:[#allocation4] sm:$0xff]   ;;  %v812_v5 = vld [vmem:[#allocation2 + $0x18] sm:$0xff]  }
  0x37   :  { %742 = vmatprep.subr.bf16.mxu1 %v925_v0  ;;  %758 = vmatprep.mubr.msk.bf16.mxu1 %vm926_vm0, %v925_v0  ;;  %v819_v6 = vld [vmem:[#allocation4 + $0x8] sm:$0xff]   ;;  %v813_v7 = vld [vmem:[#allocation2 + $0x20] sm:$0xff]   ;;  %v820_v8 = vld [vmem:[#allocation4 + $0x10] sm:$0xff]   ;;  %v1061_v27 = vand.u32 127, %v195_v26 }
  0x38   :  { %723 = vmatpush3.bf16.msra.mxu0 %v809_v1  ;;  %743 = vmatpush3.bf16.msra.mxu1 %v818_v4  ;;  %v814_v9 = vld [vmem:[#allocation2 + $0x28] sm:$0xff]   ;;  %v821_v10 = vld [vmem:[#allocation4 + $0x18] sm:$0xff]   ;;  %v815_v11 = vld [vmem:[#allocation2 + $0x30] sm:$0xff]  }
  0x39   :  { %724 = vmatprep.subr.bf16.mxu0 %v925_v0  ;;  %744 = vmatprep.subr.bf16.mxu1 %v925_v0  ;;  %v822_v12 = vld [vmem:[#allocation4 + $0x20] sm:$0xff]   ;;  %v816_v13 = vld [vmem:[#allocation2 + $0x38] sm:$0xff]   ;;  %v823_v14 = vld [vmem:[#allocation4 + $0x28] sm:$0xff]   ;;  %vm197_vm1 = vcmp.lt.s32.totalorder %v1061_v27, 32 }
  0x3a   :  { %v817_v15 = vld [vmem:[%s1121_s0] sm:$0xff]   ;;  %v824_v16 = vld [vmem:[#allocation4 + $0x30] sm:$0xff]   ;;  %v825_v17 = vld [vmem:[#allocation4 + $0x38] sm:$0xff]  }
  0x3b   :  { %v642_v18 = vld [vmem:[%s1123_s2] ss:$0 sm:$0xff]  ;;  %v827_v48 = vld [vmem:[#allocation4 + $0x48] sm:$0xff]   ;;  %v828_v49 = vld [vmem:[#allocation4 + $0x50] sm:$0xff]  }
  0x3c   :  { %725 = vmatpush3.bf16.msra.mxu0 %v810_v2  ;;  %745 = vmatpush3.bf16.msra.mxu1 %v819_v6  ;;  %v652_v28 = vld [vmem:[%s1125_s4] ss:$0 sm:$0xff]  ;;  %v829_v50 = vld [vmem:[#allocation4 + $0x58] sm:$0xff]   ;;  %v831_v52 = vld [vmem:[#allocation4 + $0x68] sm:$0xff]  }
  0x3d   :  { %726 = vmatprep.subr.bf16.mxu0 %v925_v0  ;;  %746 = vmatprep.subr.bf16.mxu1 %v925_v0  ;;  %v826_v37 = vld [vmem:[#allocation4 + $0x40] sm:$0xff]   ;;  %v832_v53 = vld [vmem:[#allocation4 + $0x70] sm:$0xff]   ;;  %v833_v54 = vld [vmem:[#allocation4 + $0x78] sm:$0xff]  }
  0x3e   :  { %v830_v51 = vld [vmem:[#allocation4 + $0x60] sm:$0xff]   ;;  %v839_v27 = vld [vmem:[#allocation6 + $0x28] sm:$0xff]  }
  0x3f   :  { %v661_v62 = vld [vmem:[%s1126_s5] ss:$0 sm:$0xff] }
  0x40   :  { %727 = vmatpush3.bf16.msra.mxu0 %v811_v3  ;;  %747 = vmatpush3.bf16.msra.mxu1 %v820_v8  ;;  %v662_v3 = vld [vmem:[%s1127_s6] ss:$0 sm:$0xff] }
  0x41   :  { %728 = vmatprep.subr.bf16.mxu0 %v925_v0  ;;  %748 = vmatprep.subr.bf16.mxu1 %v925_v0 }
  0x44   :  { %729 = vmatpush3.bf16.msra.mxu0 %v812_v5  ;;  %749 = vmatpush3.bf16.msra.mxu1 %v821_v10 }
  0x45   :  { %730 = vmatprep.subr.bf16.mxu0 %v925_v0  ;;  %750 = vmatprep.subr.bf16.mxu1 %v925_v0 }
  0x48   :  { %731 = vmatpush3.bf16.msra.mxu0 %v813_v7  ;;  %751 = vmatpush3.bf16.msra.mxu1 %v822_v12 }
  0x49   :  { %732 = vmatprep.subr.bf16.mxu0 %v925_v0  ;;  %752 = vmatprep.subr.bf16.mxu1 %v925_v0 }
  0x4c   :  { %733 = vmatpush3.bf16.msra.mxu0 %v814_v9  ;;  %753 = vmatpush3.bf16.msra.mxu1 %v823_v14 }
  0x4d   :  { %734 = vmatprep.subr.bf16.mxu0 %v925_v0  ;;  %754 = vmatprep.subr.bf16.mxu1 %v925_v0 }
  0x50   :  { %735 = vmatpush3.bf16.msra.mxu0 %v815_v11  ;;  %755 = vmatpush3.bf16.msra.mxu1 %v824_v16  ;;  %v664_v11 = vld [vmem:[%s1125_s4 + $0x1] ss:$0 sm:$0xff] }
  0x51   :  { %736 = vmatprep.subr.bf16.mxu0 %v925_v0  ;;  %756 = vmatprep.subr.bf16.mxu1 %v925_v0 }
  0x54   :  { %737 = vmatpush3.bf16.msra.mxu0 %v816_v13  ;;  %757 = vmatpush3.bf16.msra.mxu1 %v825_v17 }
  0x55   :  { %762 = vmatprep.subr.bf16.mxu0 %v925_v0  ;;  %782 = vmatprep.subr.bf16.mxu1 %v925_v0 }
  0x57   :  { %739 = vmatmul.mubr.bf16.vlgmr.msra.gmra.mrb[0].mxu0 %v817_v15 }
  0x58   :  { %778 = vmatprep.mubr.msk.bf16.mxu0 %vm926_vm0, %v925_v0  ;;  %763 = vmatpush3.bf16.msra.mxu0 %v826_v37  ;;  %v841_v37 = vld [vmem:[#allocation6 + $0x38] sm:$0xff]  }
  0x59   :  { %764 = vmatprep.subr.bf16.mxu0 %v925_v0 }
  0x5c   :  { %765 = vmatpush3.bf16.msra.mxu0 %v827_v48 }
  0x5d   :  { %766 = vmatprep.subr.bf16.mxu0 %v925_v0 }
  0x60   :  { %767 = vmatpush3.bf16.msra.mxu0 %v828_v49 }
  0x61   :  { %768 = vmatprep.subr.bf16.mxu0 %v925_v0 }
  0x64   :  { %769 = vmatpush3.bf16.msra.mxu0 %v829_v50 }
  0x65   :  { %770 = vmatprep.subr.bf16.mxu0 %v925_v0 }
  0x68   :  { %771 = vmatpush3.bf16.msra.mxu0 %v830_v51 }
  0x69   :  { %772 = vmatprep.subr.bf16.mxu0 %v925_v0 }
  0x6c   :  { %773 = vmatpush3.bf16.msra.mxu0 %v831_v52 }
  0x6d   :  { %774 = vmatprep.subr.bf16.mxu0 %v925_v0 }
  0x70   :  { %775 = vmatpush3.bf16.msra.mxu0 %v832_v53 }
  0x71   :  { %776 = vmatprep.subr.bf16.mxu0 %v925_v0 }
  0x74   :  { %777 = vmatpush3.bf16.msra.mxu0 %v833_v54 }
 0x12a   :  { %v187_v19 = vpop.f32.mrb[0].mxu0 }
 0x12b   :  { %v740_v20 = vpop.f32.mrb[1].mxu0  ;;  %v188_v22 = vadd.f32 %v642_v18, %v187_v19 }
 0x12c   :  { %v190_v21 = vpop.f32.mrb[2].mxu0  ;;  %v834_v20 = vld [vmem:[#allocation6] sm:$0xff]  }
 0x12d   :  { %v191_v23 = vadd.f32 %v642_v18, %v190_v21  ;;  %v741_v24 = vpop.f32.mrb[3].mxu0 }
 0x12f   :  { %v194_v25 = vpack.c.bf16 %v191_v23, %v188_v22 }
 0x131   :  { %759 = vmatmul.mubr.bf16.vlgmr.msra.gmra.mrb[0].mxu1 %v194_v25 }
 0x132   :  { %798 = vmatprep.mubr.msk.bf16.mxu1 %vm926_vm0, %v925_v0  ;;  %783 = vmatpush3.bf16.msra.mxu1 %v834_v20 }
 0x133   :  { %784 = vmatprep.subr.bf16.mxu1 %v925_v0 }
 0x204   :  { %v303_v29 = vpop.f32.mrb[0].mxu1 }
 0x205   :  { %v304_v30 = vadd.f32 %v652_v28, %v303_v29  ;;  %v760_v31 = vpop.f32.mrb[1].mxu1 }
 0x206   :  { %v306_v32 = vpop.f32.mrb[2].mxu1 }
 0x207   :  { %v307_v33 = vadd.f32 %v652_v28, %v306_v32  ;;  %v761_v34 = vpop.f32.mrb[3].mxu1  ;;  %v312_v35 = vsel %vm197_vm1, %v304_v30, 0.0  ;;  %v835_v32 = vld [vmem:[#allocation6 + $0x8] sm:$0xff]  }
 0x208   :  { %314 = vadd.xlane.f32.xlu0 %v312_v35  ;;  %785 = vmatpush3.bf16.msra.mxu1 %v835_v32  ;;  %v837_v34 = vld [vmem:[#allocation6 + $0x18] sm:$0xff]   ;;  %v838_v35 = vld [vmem:[#allocation6 + $0x20] sm:$0xff]  }
 0x209   :  { %v313_v36 = vsel %vm197_vm1, %v307_v33, 0.0  ;;  %786 = vmatprep.subr.bf16.mxu1 %v925_v0 }
 0x20c   :  { %316 = vadd.xlane.f32.xlu0 %v313_v36  ;;  %v840_v36 = vld [vmem:[#allocation6 + $0x30] sm:$0xff]  }
 0x295   :  { %v315_v38 = vpop.xlane.xlu0 %314 }
 0x296   :  { %v318_v39 = vmul.f32 0.03125, %v315_v38 }
 0x298   :  { %v320_v40 = vsub.f32 %v304_v30, %v318_v39 }
 0x299   :  { %v317_v41 = vpop.xlane.xlu0 %316 }
 0x29a   :  { %v319_v42 = vmul.f32 0.03125, %v317_v41  ;;  %v322_v43 = vsel %vm197_vm1, %v320_v40, 0.0 }
 0x29b   :  { %v324_v44 = vmul.f32 %v322_v43, %v322_v43 }
 0x29c   :  { %v321_v45 = vsub.f32 %v307_v33, %v319_v42  ;;  %v836_v33 = vld [vmem:[#allocation6 + $0x10] sm:$0xff]  }
 0x29d   :  { %326 = vadd.xlane.f32.xlu1 %v324_v44  ;;  %787 = vmatpush3.bf16.msra.mxu1 %v836_v33 }
 0x29e   :  { %v323_v46 = vsel %vm197_vm1, %v321_v45, 0.0  ;;  %788 = vmatprep.subr.bf16.mxu1 %v925_v0  ;;  %v674_v45 = vld [vmem:[%s1126_s5 + $0x1] ss:$0 sm:$0xff] }
 0x29f   :  { %v325_v47 = vmul.f32 %v323_v46, %v323_v46 }
 0x2a1   :  { %328 = vadd.xlane.f32.xlu1 %v325_v47  ;;  %789 = vmatpush3.bf16.msra.mxu1 %v837_v34 }
 0x2a2   :  { %790 = vmatprep.subr.bf16.mxu1 %v925_v0 }
 0x2a5   :  { %791 = vmatpush3.bf16.msra.mxu1 %v838_v35 }
 0x2a6   :  { %792 = vmatprep.subr.bf16.mxu1 %v925_v0 }
 0x2a9   :  { %793 = vmatpush3.bf16.msra.mxu1 %v839_v27 }
 0x2aa   :  { %794 = vmatprep.subr.bf16.mxu1 %v925_v0 }
 0x2ad   :  { %795 = vmatpush3.bf16.msra.mxu1 %v840_v36 }
 0x2ae   :  { %796 = vmatprep.subr.bf16.mxu1 %v925_v0  ;;  %v676_v0 = vld [vmem:[%s1127_s6 + $0x1] ss:$0 sm:$0xff] }
 0x2b1   :  { %797 = vmatpush3.bf16.msra.mxu1 %v841_v37 }
 0x32a   :  { %v327_v55 = vpop.xlane.xlu1 %326 }
 0x32b   :  { %v330_v56 = vmul.f32 0.03125, %v327_v55 }
 0x32d   :  { %v332_v57 = vadd.f32 1e-05, %v330_v56  ;;  %v677_v56 = vld [vmem:[%s1129_s8] ss:$0 sm:$0xff] }
 0x32e   :  { %v329_v58 = vpop.xlane.xlu1 %328 }
 0x32f   :  { %842 = vrsqrt.f32 %v332_v57  ;;  %v331_v59 = vmul.f32 0.03125, %v329_v58 }
 0x331   :  { %v333_v60 = vadd.f32 1e-05, %v331_v59 }
 0x333   :  { %844 = vrsqrt.f32 %v333_v60 }
 0x339   :  { %v843_v61 = vpop.eup %842 }
 0x33a   :  { %v336_v63 = vmul.f32 %v843_v61, %v322_v43 }
 0x33c   :  { %v345_v1 = vmul.f32 %v661_v62, %v336_v63 }
 0x33d   :  { %v845_v2 = vpop.eup %844 }
 0x33e   :  { %v337_v4 = vmul.f32 %v845_v2, %v323_v46  ;;  %v354_v6 = vadd.f32 %v662_v3, %v345_v1 }
 0x340   :  { %v346_v5 = vmul.f32 %v661_v62, %v337_v4  ;;  %v356_v8 = vmax.f32 %v354_v6, 0.0 }
 0x342   :  { %v355_v7 = vadd.f32 %v662_v3, %v346_v5 }
 0x344   :  { %v357_v9 = vmax.f32 %v355_v7, 0.0 }
 0x346   :  { %v358_v10 = vpack.c.bf16 %v357_v9, %v356_v8 }
 0x348   :  { %779 = vmatmul.mubr.bf16.vlgmr.msra.gmra.mrb[4].mxu0 %v358_v10 }
 0x41b   :  { %v466_v12 = vpop.f32.mrb[4].mxu0 }
 0x41c   :  { %v467_v13 = vadd.f32 %v664_v11, %v466_v12  ;;  %v780_v14 = vpop.f32.mrb[5].mxu0 }
 0x41d   :  { %v469_v15 = vpop.f32.mrb[6].mxu0 }
 0x41e   :  { %v470_v16 = vadd.f32 %v664_v11, %v469_v15  ;;  %v781_v17 = vpop.f32.mrb[7].mxu0  ;;  %v473_v18 = vsel %vm197_vm1, %v467_v13, 0.0 }
 0x41f   :  { %475 = vadd.xlane.f32.xlu0 %v473_v18 }
 0x420   :  { %v474_v19 = vsel %vm197_vm1, %v470_v16, 0.0 }
 0x421   :  { %477 = vadd.xlane.f32.xlu1 %v474_v19 }
 0x4ac   :  { %v476_v21 = vpop.xlane.xlu0 %475 }
 0x4ad   :  { %v479_v22 = vmul.f32 0.03125, %v476_v21 }
 0x4ae   :  { %v478_v23 = vpop.xlane.xlu1 %477 }
 0x4af   :  { %v481_v24 = vsub.f32 %v467_v13, %v479_v22  ;;  %v480_v25 = vmul.f32 0.03125, %v478_v23 }
 0x4b1   :  { %v482_v26 = vsub.f32 %v470_v16, %v480_v25  ;;  %v483_v28 = vsel %vm197_vm1, %v481_v24, 0.0 }
 0x4b2   :  { %v485_v29 = vmul.f32 %v483_v28, %v483_v28 }
 0x4b3   :  { %v484_v30 = vsel %vm197_vm1, %v482_v26, 0.0 }
 0x4b4   :  { %487 = vadd.xlane.f32.xlu0 %v485_v29  ;;  %v486_v31 = vmul.f32 %v484_v30, %v484_v30 }
 0x4b6   :  { %489 = vadd.xlane.f32.xlu1 %v486_v31 }
 0x541   :  { %v488_v38 = vpop.xlane.xlu0 %487 }
 0x542   :  { %v491_v39 = vmul.f32 0.03125, %v488_v38 }
 0x543   :  { %v490_v40 = vpop.xlane.xlu1 %489 }
 0x544   :  { %v493_v41 = vadd.f32 1e-05, %v491_v39  ;;  %v492_v42 = vmul.f32 0.03125, %v490_v40 }
 0x546   :  { %846 = vrsqrt.f32 %v493_v41  ;;  %v494_v43 = vadd.f32 1e-05, %v492_v42 }
 0x548   :  { %848 = vrsqrt.f32 %v494_v43 }
 0x550   :  { %v847_v44 = vpop.eup %846 }
 0x551   :  { %v497_v46 = vmul.f32 %v847_v44, %v483_v28 }
 0x552   :  { %v849_v47 = vpop.eup %848 }
 0x553   :  { %v498_v48 = vmul.f32 %v849_v47, %v484_v30  ;;  %v507_v49 = vmul.f32 %v674_v45, %v497_v46 }
 0x555   :  { %v508_v50 = vmul.f32 %v674_v45, %v498_v48  ;;  %v517_v51 = vadd.f32 %v676_v0, %v507_v49 }
 0x557   :  { %v518_v52 = vadd.f32 %v676_v0, %v508_v50  ;;  %v519_v53 = vmax.f32 %v517_v51, 0.0 }
 0x559   :  { %v520_v54 = vmax.f32 %v518_v52, 0.0 }
 0x55b   :  { %v521_v55 = vpack.c.bf16 %v520_v54, %v519_v53 }
 0x55d   :  { %799 = vmatmul.mubr.bf16.vlgmr.msra.gmra.mrb[4].mxu1 %v521_v55 }
 0x630   :  { %v627_v57 = vpop.f32.mrb[4].mxu1 }
 0x631   :  { %v628_v58 = vadd.f32 %v677_v56, %v627_v57  ;;  %v800_v59 = vpop.f32.mrb[5].mxu1 }
 0x632   :  { %v630_v60 = vpop.f32.mrb[6].mxu1 }
 0x633   :  { %634 = vst [vmem:[%s1130_s9] sm:$0xff] %v628_v58  ;;  %v631_v61 = vadd.f32 %v677_v56, %v630_v60  ;;  %v801_v62 = vpop.f32.mrb[7].mxu1 }
 0x635   :  { %635 = vst [vmem:[%s1130_s9 + $0x8] sm:$0xff] %v631_v61 }
 0x636   :  { %640 = vsyncpa [#allocation3], 1 }
 0x637   :  { %641 = vsyncpa [#allocation5], 1 }

// kernel: _mlp_forward_impl.1
= control target key start
LH: loop header
LB: loop body
LE: loop exit
PB: predicated region body
PF: predicated region fallthrough
CT: control target
= control target key end

     0   :  { %14 = vsyncpa [#allocation3], 0  ;;  %s1121_s0 = inlined_call_operand.vmem [shape: bf16[16,128], index: 0, kind: input, shape index: {}]   ;;  %s1122_s1 = inlined_call_operand.hbm [shape: bf16[128,128], index: 1, kind: input, shape index: {}]   ;;  %s1123_s2 = inlined_call_operand.vmem [shape: f32[1,128], index: 2, kind: input, shape index: {}]   ;;  %s1124_s3 = inlined_call_operand.hbm [shape: bf16[2,128,128], index: 3, kind: input, shape index: {}]   ;;  %s1125_s4 = inlined_call_operand.vmem [shape: f32[2,1,128], index: 4, kind: input, shape index: {}]   ;;  %s1126_s5 = inlined_call_operand.vmem [shape: f32[2,1,128], index: 5, kind: input, shape index: {}]   ;;  %s1127_s6 = inlined_call_operand.vmem [shape: f32[2,1,128], index: 6, kind: input, shape index: {}]   ;;  %s1128_s7 = inlined_call_operand.hbm [shape: bf16[128,128], index: 7, kind: input, shape index: {}]   ;;  %s1129_s8 = inlined_call_operand.vmem [shape: f32[1,128], index: 8, kind: input, shape index: {}]   ;;  %s1130_s9 = inlined_call_operand.vmem [shape: f32[16,128], index: 9, kind: output, shape index: {}]  }
   0x1   :  { %15 = vsyncpa [#allocation5], 0  ;;  %s920_s30 = smov [#allocation4]   ;;  %s921_s11 = smov [#allocation2]  }
   0x2   :  { %s37_s10 = sshll.u32 %s920_s30, 4  ;;  %s23_s12 = sshll.u32 %s921_s11, 4  ;;  %s38_s10 = int_to_ptr.vmem [resolvable:$true] %s37_s10  ;;  %s977_s12 = int_to_ptr.vmem [resolvable:$true] %s23_s12 }
   0x3   :  { %s850_s15 = scalar_lea.hbm %s1124_s3, 2048 }
   0x4   :  { %p851_p0 = scmp.ne.s32.totalorder %s1124_s3, %s850_s15  ;;  %p854_p1 = scmp.lt.u32.totalorder %s850_s15, %s1124_s3 }
   0x6   :  { %p856_p2 = pnand %p854_p1, %p851_p0 }
   0x8   :  { %859 = shalt.err (!%p856_p2)
}
   0x9   :  { %s860_s20 = scalar_lea.vmem %s38_s10, 2048  ;;  %p865_p4 = scmp.lt.s32.totalorder %s38_s10, %s38_s10 }
   0xa   :  { %p861_p3 = scmp.ne.s32.totalorder %s38_s10, %s860_s20  ;;  %p866_p5 = scmp.lt.s32.totalorder %s860_s20, %s860_s20 }
   0xc   :  { %p867_p6 = por %p866_p5, %p865_p4 }
   0xe   :  { %p868_p7 = pnand %p867_p6, %p861_p3 }
  0x10   :  { %871 = shalt.err (!%p868_p7)
}
  0x11   :  { %s922_s21 = smov 64   ;;  %s923_s22 = smov 4  }
  0x12   :  { %43 = dma.hbm_to_vmem [thread:$0]  %s1124_s3, 2048, %s38_s10, [#allocation5], %s922_s21, %s922_s21, %s923_s22  }
  0x13   :  { %s872_s27 = scalar_lea.hbm %s1122_s1, 1024 }
  0x14   :  { %p873_p8 = scmp.ne.s32.totalorder %s1122_s1, %s872_s27  ;;  %p876_p9 = scmp.lt.u32.totalorder %s872_s27, %s1122_s1 }
  0x16   :  { %p878_p10 = pnand %p876_p9, %p873_p8 }
  0x18   :  { %881 = shalt.err (!%p878_p10)
}
  0x19   :  { %s882_s13 = scalar_lea.vmem %s977_s12, 1024  ;;  %p887_p12 = scmp.lt.s32.totalorder %s977_s12, %s977_s12 }
  0x1a   :  { %p883_p11 = scmp.ne.s32.totalorder %s977_s12, %s882_s13  ;;  %p888_p13 = scmp.lt.s32.totalorder %s882_s13, %s882_s13 }
  0x1c   :  { %p889_p0 = por %p888_p13, %p887_p12 }
  0x1e   :  { %p890_p1 = pnand %p889_p0, %p883_p11 }
  0x20   :  { %893 = shalt.err (!%p890_p1)
}
  0x21   :  { %29 = dma.hbm_to_vmem [thread:$0]  %s1122_s1, 1024, %s977_s12, [#allocation3], %s922_s21, %s922_s21, %s923_s22  }
  0x22   :  { %s924_s14 = smov [#allocation6]   ;;  %s894_s18 = scalar_lea.hbm %s1128_s7, 1024 }
  0x23   :  { %s55_s15 = sshll.u32 %s924_s14, 4  ;;  %p895_p2 = scmp.ne.s32.totalorder %s1128_s7, %s894_s18  ;;  %s56_s15 = int_to_ptr.vmem [resolvable:$true] %s55_s15 }
  0x24   :  { %p898_p3 = scmp.lt.u32.totalorder %s894_s18, %s1128_s7 }
  0x26   :  { %p900_p4 = pnand %p898_p3, %p895_p2 }
  0x28   :  { %903 = shalt.err (!%p900_p4)
}
  0x29   :  { %s904_s25 = scalar_lea.vmem %s56_s15, 1024  ;;  %p909_p6 = scmp.lt.s32.totalorder %s56_s15, %s56_s15 }
  0x2a   :  { %p905_p5 = scmp.ne.s32.totalorder %s56_s15, %s904_s25  ;;  %p910_p7 = scmp.lt.s32.totalorder %s904_s25, %s904_s25 }
  0x2c   :  { %p911_p8 = por %p910_p7, %p909_p6 }
  0x2e   :  { %p912_p9 = pnand %p911_p8, %p905_p5 }
  0x30   :  { %915 = shalt.err (!%p912_p9)
}
  0x31   :  { %61 = dma.hbm_to_vmem [thread:$0]  %s1128_s7, 1024, %s56_s15, [#allocation5], %s922_s21, %s922_s21, %s923_s22  }
  0x32   :  { %916 = dma.done.wait [#allocation3], 1024  }
  0x33   :  { %917 = vsyncadd [#allocation3], 4294966272 }
  0x34   :  { %918 = dma.done.wait [#allocation5], 3072  }
  0x35   :  { %919 = vsyncadd [#allocation5], 4294964224  ;;  %v925_v0 = vmov 0.0   ;;  %vm926_vm0 = vmmov 0   ;;  %v809_v1 = vld [vmem:[#allocation2] sm:$0xff]   ;;  %v810_v2 = vld [vmem:[#allocation2 + $0x8] sm:$0xff]   ;;  %v195_v26 = vlaneseq }
  0x36   :  { %722 = vmatprep.subr.bf16.mxu0 %v925_v0  ;;  %738 = vmatprep.mubr.msk.bf16.mxu0 %vm926_vm0, %v925_v0  ;;  %v811_v3 = vld [vmem:[#allocation2 + $0x10] sm:$0xff]   ;;  %v818_v4 = vld [vmem:[#allocation4] sm:$0xff]   ;;  %v812_v5 = vld [vmem:[#allocation2 + $0x18] sm:$0xff]  }
  0x37   :  { %742 = vmatprep.subr.bf16.mxu1 %v925_v0  ;;  %758 = vmatprep.mubr.msk.bf16.mxu1 %vm926_vm0, %v925_v0  ;;  %v819_v6 = vld [vmem:[#allocation4 + $0x8] sm:$0xff]   ;;  %v813_v7 = vld [vmem:[#allocation2 + $0x20] sm:$0xff]   ;;  %v820_v8 = vld [vmem:[#allocation4 + $0x10] sm:$0xff]   ;;  %v1061_v27 = vand.u32 127, %v195_v26 }
  0x38   :  { %723 = vmatpush3.bf16.msra.mxu0 %v809_v1  ;;  %743 = vmatpush3.bf16.msra.mxu1 %v818_v4  ;;  %v814_v9 = vld [vmem:[#allocation2 + $0x28] sm:$0xff]   ;;  %v821_v10 = vld [vmem:[#allocation4 + $0x18] sm:$0xff]   ;;  %v815_v11 = vld [vmem:[#allocation2 + $0x30] sm:$0xff]  }
  0x39   :  { %724 = vmatprep.subr.bf16.mxu0 %v925_v0  ;;  %744 = vmatprep.subr.bf16.mxu1 %v925_v0  ;;  %v822_v12 = vld [vmem:[#allocation4 + $0x20] sm:$0xff]   ;;  %v816_v13 = vld [vmem:[#allocation2 + $0x38] sm:$0xff]   ;;  %v823_v14 = vld [vmem:[#allocation4 + $0x28] sm:$0xff]   ;;  %vm197_vm1 = vcmp.lt.s32.totalorder %v1061_v27, 32 }
  0x3a   :  { %v817_v15 = vld [vmem:[%s1121_s0] sm:$0xff]   ;;  %v824_v16 = vld [vmem:[#allocation4 + $0x30] sm:$0xff]   ;;  %v825_v17 = vld [vmem:[#allocation4 + $0x38] sm:$0xff]  }
  0x3b   :  { %v642_v18 = vld [vmem:[%s1123_s2] ss:$0 sm:$0xff]  ;;  %v827_v48 = vld [vmem:[#allocation4 + $0x48] sm:$0xff]   ;;  %v828_v49 = vld [vmem:[#allocation4 + $0x50] sm:$0xff]  }
  0x3c   :  { %725 = vmatpush3.bf16.msra.mxu0 %v810_v2  ;;  %745 = vmatpush3.bf16.msra.mxu1 %v819_v6  ;;  %v652_v28 = vld [vmem:[%s1125_s4] ss:$0 sm:$0xff]  ;;  %v829_v50 = vld [vmem:[#allocation4 + $0x58] sm:$0xff]   ;;  %v831_v52 = vld [vmem:[#allocation4 + $0x68] sm:$0xff]  }
  0x3d   :  { %726 = vmatprep.subr.bf16.mxu0 %v925_v0  ;;  %746 = vmatprep.subr.bf16.mxu1 %v925_v0  ;;  %v826_v37 = vld [vmem:[#allocation4 + $0x40] sm:$0xff]   ;;  %v832_v53 = vld [vmem:[#allocation4 + $0x70] sm:$0xff]   ;;  %v833_v54 = vld [vmem:[#allocation4 + $0x78] sm:$0xff]  }
  0x3e   :  { %v830_v51 = vld [vmem:[#allocation4 + $0x60] sm:$0xff]   ;;  %v839_v27 = vld [vmem:[#allocation6 + $0x28] sm:$0xff]  }
  0x3f   :  { %v661_v62 = vld [vmem:[%s1126_s5] ss:$0 sm:$0xff] }
  0x40   :  { %727 = vmatpush3.bf16.msra.mxu0 %v811_v3  ;;  %747 = vmatpush3.bf16.msra.mxu1 %v820_v8  ;;  %v662_v3 = vld [vmem:[%s1127_s6] ss:$0 sm:$0xff] }
  0x41   :  { %728 = vmatprep.subr.bf16.mxu0 %v925_v0  ;;  %748 = vmatprep.subr.bf16.mxu1 %v925_v0 }
  0x44   :  { %729 = vmatpush3.bf16.msra.mxu0 %v812_v5  ;;  %749 = vmatpush3.bf16.msra.mxu1 %v821_v10 }
  0x45   :  { %730 = vmatprep.subr.bf16.mxu0 %v925_v0  ;;  %750 = vmatprep.subr.bf16.mxu1 %v925_v0 }
  0x48   :  { %731 = vmatpush3.bf16.msra.mxu0 %v813_v7  ;;  %751 = vmatpush3.bf16.msra.mxu1 %v822_v12 }
  0x49   :  { %732 = vmatprep.subr.bf16.mxu0 %v925_v0  ;;  %752 = vmatprep.subr.bf16.mxu1 %v925_v0 }
  0x4c   :  { %733 = vmatpush3.bf16.msra.mxu0 %v814_v9  ;;  %753 = vmatpush3.bf16.msra.mxu1 %v823_v14 }
  0x4d   :  { %734 = vmatprep.subr.bf16.mxu0 %v925_v0  ;;  %754 = vmatprep.subr.bf16.mxu1 %v925_v0 }
  0x50   :  { %735 = vmatpush3.bf16.msra.mxu0 %v815_v11  ;;  %755 = vmatpush3.bf16.msra.mxu1 %v824_v16  ;;  %v664_v11 = vld [vmem:[%s1125_s4 + $0x1] ss:$0 sm:$0xff] }
  0x51   :  { %736 = vmatprep.subr.bf16.mxu0 %v925_v0  ;;  %756 = vmatprep.subr.bf16.mxu1 %v925_v0 }
  0x54   :  { %737 = vmatpush3.bf16.msra.mxu0 %v816_v13  ;;  %757 = vmatpush3.bf16.msra.mxu1 %v825_v17 }
  0x55   :  { %762 = vmatprep.subr.bf16.mxu0 %v925_v0  ;;  %782 = vmatprep.subr.bf16.mxu1 %v925_v0 }
  0x57   :  { %739 = vmatmul.mubr.bf16.vlgmr.msra.gmra.mrb[0].mxu0 %v817_v15 }
  0x58   :  { %778 = vmatprep.mubr.msk.bf16.mxu0 %vm926_vm0, %v925_v0  ;;  %763 = vmatpush3.bf16.msra.mxu0 %v826_v37  ;;  %v841_v37 = vld [vmem:[#allocation6 + $0x38] sm:$0xff]  }
  0x59   :  { %764 = vmatprep.subr.bf16.mxu0 %v925_v0 }
  0x5c   :  { %765 = vmatpush3.bf16.msra.mxu0 %v827_v48 }
  0x5d   :  { %766 = vmatprep.subr.bf16.mxu0 %v925_v0 }
  0x60   :  { %767 = vmatpush3.bf16.msra.mxu0 %v828_v49 }
  0x61   :  { %768 = vmatprep.subr.bf16.mxu0 %v925_v0 }
  0x64   :  { %769 = vmatpush3.bf16.msra.mxu0 %v829_v50 }
  0x65   :  { %770 = vmatprep.subr.bf16.mxu0 %v925_v0 }
  0x68   :  { %771 = vmatpush3.bf16.msra.mxu0 %v830_v51 }
  0x69   :  { %772 = vmatprep.subr.bf16.mxu0 %v925_v0 }
  0x6c   :  { %773 = vmatpush3.bf16.msra.mxu0 %v831_v52 }
  0x6d   :  { %774 = vmatprep.subr.bf16.mxu0 %v925_v0 }
  0x70   :  { %775 = vmatpush3.bf16.msra.mxu0 %v832_v53 }
  0x71   :  { %776 = vmatprep.subr.bf16.mxu0 %v925_v0 }
  0x74   :  { %777 = vmatpush3.bf16.msra.mxu0 %v833_v54 }
 0x12a   :  { %v187_v19 = vpop.f32.mrb[0].mxu0 }
 0x12b   :  { %v740_v20 = vpop.f32.mrb[1].mxu0  ;;  %v188_v22 = vadd.f32 %v642_v18, %v187_v19 }
 0x12c   :  { %v190_v21 = vpop.f32.mrb[2].mxu0  ;;  %v834_v20 = vld [vmem:[#allocation6] sm:$0xff]  }
 0x12d   :  { %v191_v23 = vadd.f32 %v642_v18, %v190_v21  ;;  %v741_v24 = vpop.f32.mrb[3].mxu0 }
 0x12f   :  { %v194_v25 = vpack.c.bf16 %v191_v23, %v188_v22 }
 0x131   :  { %759 = vmatmul.mubr.bf16.vlgmr.msra.gmra.mrb[0].mxu1 %v194_v25 }
 0x132   :  { %798 = vmatprep.mubr.msk.bf16.mxu1 %vm926_vm0, %v925_v0  ;;  %783 = vmatpush3.bf16.msra.mxu1 %v834_v20 }
 0x133   :  { %784 = vmatprep.subr.bf16.mxu1 %v925_v0 }
 0x204   :  { %v303_v29 = vpop.f32.mrb[0].mxu1 }
 0x205   :  { %v304_v30 = vadd.f32 %v652_v28, %v303_v29  ;;  %v760_v31 = vpop.f32.mrb[1].mxu1 }
 0x206   :  { %v306_v32 = vpop.f32.mrb[2].mxu1 }
 0x207   :  { %v307_v33 = vadd.f32 %v652_v28, %v306_v32  ;;  %v761_v34 = vpop.f32.mrb[3].mxu1  ;;  %v312_v35 = vsel %vm197_vm1, %v304_v30, 0.0  ;;  %v835_v32 = vld [vmem:[#allocation6 + $0x8] sm:$0xff]  }
 0x208   :  { %314 = vadd.xlane.f32.xlu0 %v312_v35  ;;  %785 = vmatpush3.bf16.msra.mxu1 %v835_v32  ;;  %v837_v34 = vld [vmem:[#allocation6 + $0x18] sm:$0xff]   ;;  %v838_v35 = vld [vmem:[#allocation6 + $0x20] sm:$0xff]  }
 0x209   :  { %v313_v36 = vsel %vm197_vm1, %v307_v33, 0.0  ;;  %786 = vmatprep.subr.bf16.mxu1 %v925_v0 }
 0x20c   :  { %316 = vadd.xlane.f32.xlu0 %v313_v36  ;;  %v840_v36 = vld [vmem:[#allocation6 + $0x30] sm:$0xff]  }
 0x295   :  { %v315_v38 = vpop.xlane.xlu0 %314 }
 0x296   :  { %v318_v39 = vmul.f32 0.03125, %v315_v38 }
 0x298   :  { %v320_v40 = vsub.f32 %v304_v30, %v318_v39 }
 0x299   :  { %v317_v41 = vpop.xlane.xlu0 %316 }
 0x29a   :  { %v319_v42 = vmul.f32 0.03125, %v317_v41  ;;  %v322_v43 = vsel %vm197_vm1, %v320_v40, 0.0 }
 0x29b   :  { %v324_v44 = vmul.f32 %v322_v43, %v322_v43 }
 0x29c   :  { %v321_v45 = vsub.f32 %v307_v33, %v319_v42  ;;  %v836_v33 = vld [vmem:[#allocation6 + $0x10] sm:$0xff]  }
 0x29d   :  { %326 = vadd.xlane.f32.xlu1 %v324_v44  ;;  %787 = vmatpush3.bf16.msra.mxu1 %v836_v33 }
 0x29e   :  { %v323_v46 = vsel %vm197_vm1, %v321_v45, 0.0  ;;  %788 = vmatprep.subr.bf16.mxu1 %v925_v0  ;;  %v674_v45 = vld [vmem:[%s1126_s5 + $0x1] ss:$0 sm:$0xff] }
 0x29f   :  { %v325_v47 = vmul.f32 %v323_v46, %v323_v46 }
 0x2a1   :  { %328 = vadd.xlane.f32.xlu1 %v325_v47  ;;  %789 = vmatpush3.bf16.msra.mxu1 %v837_v34 }
 0x2a2   :  { %790 = vmatprep.subr.bf16.mxu1 %v925_v0 }
 0x2a5   :  { %791 = vmatpush3.bf16.msra.mxu1 %v838_v35 }
 0x2a6   :  { %792 = vmatprep.subr.bf16.mxu1 %v925_v0 }
 0x2a9   :  { %793 = vmatpush3.bf16.msra.mxu1 %v839_v27 }
 0x2aa   :  { %794 = vmatprep.subr.bf16.mxu1 %v925_v0 }
 0x2ad   :  { %795 = vmatpush3.bf16.msra.mxu1 %v840_v36 }
 0x2ae   :  { %796 = vmatprep.subr.bf16.mxu1 %v925_v0  ;;  %v676_v0 = vld [vmem:[%s1127_s6 + $0x1] ss:$0 sm:$0xff] }
 0x2b1   :  { %797 = vmatpush3.bf16.msra.mxu1 %v841_v37 }
 0x32a   :  { %v327_v55 = vpop.xlane.xlu1 %326 }
 0x32b   :  { %v330_v56 = vmul.f32 0.03125, %v327_v55 }
 0x32d   :  { %v332_v57 = vadd.f32 1e-05, %v330_v56  ;;  %v677_v56 = vld [vmem:[%s1129_s8] ss:$0 sm:$0xff] }
 0x32e   :  { %v329_v58 = vpop.xlane.xlu1 %328 }
 0x32f   :  { %842 = vrsqrt.f32 %v332_v57  ;;  %v331_v59 = vmul.f32 0.03125, %v329_v58 }
 0x331   :  { %v333_v60 = vadd.f32 1e-05, %v331_v59 }
 0x333   :  { %844 = vrsqrt.f32 %v333_v60 }
 0x339   :  { %v843_v61 = vpop.eup %842 }
 0x33a   :  { %v336_v63 = vmul.f32 %v843_v61, %v322_v43 }
 0x33c   :  { %v345_v1 = vmul.f32 %v661_v62, %v336_v63 }
 0x33d   :  { %v845_v2 = vpop.eup %844 }
 0x33e   :  { %v337_v4 = vmul.f32 %v845_v2, %v323_v46  ;;  %v354_v6 = vadd.f32 %v662_v3, %v345_v1 }
 0x340   :  { %v346_v5 = vmul.f32 %v661_v62, %v337_v4  ;;  %v356_v8 = vmax.f32 %v354_v6, 0.0 }
 0x342   :  { %v355_v7 = vadd.f32 %v662_v3, %v346_v5 }
 0x344   :  { %v357_v9 = vmax.f32 %v355_v7, 0.0 }
 0x346   :  { %v358_v10 = vpack.c.bf16 %v357_v9, %v356_v8 }
 0x348   :  { %779 = vmatmul.mubr.bf16.vlgmr.msra.gmra.mrb[4].mxu0 %v358_v10 }
 0x41b   :  { %v466_v12 = vpop.f32.mrb[4].mxu0 }
 0x41c   :  { %v467_v13 = vadd.f32 %v664_v11, %v466_v12  ;;  %v780_v14 = vpop.f32.mrb[5].mxu0 }
 0x41d   :  { %v469_v15 = vpop.f32.mrb[6].mxu0 }
 0x41e   :  { %v470_v16 = vadd.f32 %v664_v11, %v469_v15  ;;  %v781_v17 = vpop.f32.mrb[7].mxu0  ;;  %v473_v18 = vsel %vm197_vm1, %v467_v13, 0.0 }
 0x41f   :  { %475 = vadd.xlane.f32.xlu0 %v473_v18 }
 0x420   :  { %v474_v19 = vsel %vm197_vm1, %v470_v16, 0.0 }
 0x421   :  { %477 = vadd.xlane.f32.xlu1 %v474_v19 }
 0x4ac   :  { %v476_v21 = vpop.xlane.xlu0 %475 }
 0x4ad   :  { %v479_v22 = vmul.f32 0.03125, %v476_v21 }
 0x4ae   :  { %v478_v23 = vpop.xlane.xlu1 %477 }
 0x4af   :  { %v481_v24 = vsub.f32 %v467_v13, %v479_v22  ;;  %v480_v25 = vmul.f32 0.03125, %v478_v23 }
 0x4b1   :  { %v482_v26 = vsub.f32 %v470_v16, %v480_v25  ;;  %v483_v28 = vsel %vm197_vm1, %v481_v24, 0.0 }
 0x4b2   :  { %v485_v29 = vmul.f32 %v483_v28, %v483_v28 }
 0x4b3   :  { %v484_v30 = vsel %vm197_vm1, %v482_v26, 0.0 }
 0x4b4   :  { %487 = vadd.xlane.f32.xlu0 %v485_v29  ;;  %v486_v31 = vmul.f32 %v484_v30, %v484_v30 }
 0x4b6   :  { %489 = vadd.xlane.f32.xlu1 %v486_v31 }
 0x541   :  { %v488_v38 = vpop.xlane.xlu0 %487 }
 0x542   :  { %v491_v39 = vmul.f32 0.03125, %v488_v38 }
 0x543   :  { %v490_v40 = vpop.xlane.xlu1 %489 }
 0x544   :  { %v493_v41 = vadd.f32 1e-05, %v491_v39  ;;  %v492_v42 = vmul.f32 0.03125, %v490_v40 }
 0x546   :  { %846 = vrsqrt.f32 %v493_v41  ;;  %v494_v43 = vadd.f32 1e-05, %v492_v42 }
 0x548   :  { %848 = vrsqrt.f32 %v494_v43 }
 0x550   :  { %v847_v44 = vpop.eup %846 }
 0x551   :  { %v497_v46 = vmul.f32 %v847_v44, %v483_v28 }
 0x552   :  { %v849_v47 = vpop.eup %848 }
 0x553   :  { %v498_v48 = vmul.f32 %v849_v47, %v484_v30  ;;  %v507_v49 = vmul.f32 %v674_v45, %v497_v46 }
 0x555   :  { %v508_v50 = vmul.f32 %v674_v45, %v498_v48  ;;  %v517_v51 = vadd.f32 %v676_v0, %v507_v49 }
 0x557   :  { %v518_v52 = vadd.f32 %v676_v0, %v508_v50  ;;  %v519_v53 = vmax.f32 %v517_v51, 0.0 }
 0x559   :  { %v520_v54 = vmax.f32 %v518_v52, 0.0 }
 0x55b   :  { %v521_v55 = vpack.c.bf16 %v520_v54, %v519_v53 }
 0x55d   :  { %799 = vmatmul.mubr.bf16.vlgmr.msra.gmra.mrb[4].mxu1 %v521_v55 }
 0x630   :  { %v627_v57 = vpop.f32.mrb[4].mxu1 }
 0x631   :  { %v628_v58 = vadd.f32 %v677_v56, %v627_v57  ;;  %v800_v59 = vpop.f32.mrb[5].mxu1 }
 0x632   :  { %v630_v60 = vpop.f32.mrb[6].mxu1 }
 0x633   :  { %634 = vst [vmem:[%s1130_s9] sm:$0xff] %v628_v58  ;;  %v631_v61 = vadd.f32 %v677_v56, %v630_v60  ;;  %v801_v62 = vpop.f32.mrb[7].mxu1 }
 0x635   :  { %635 = vst [vmem:[%s1130_s9 + $0x8] sm:$0xff] %v631_v61 }
 0x636   :  { %640 = vsyncpa [#allocation3], 1 }
 0x637   :  { %641 = vsyncpa [#allocation5], 1 }

</bundles_post_ra>
